<compile_context>
chip_gen: v6e
topology: v6e:2x2x1
jax: 0.10.0
libtpu: 0.0.40
codegen_flags: <defaults>
</compile_context>

<pallas_src>
import jax
import jax.numpy as jnp
from jax.experimental import pallas as pl
from jax.experimental.pallas import tpu as pltpu

# ----------------------------- problem sizes --------------------------------
B = 256      # batch (tiled over the grid)
D_IN = 256   # flattened input features
H = 128      # encoder/decoder hidden width
Z = 128      # latent width

# packed-bias layout: [b1 (H) | bhead (2Z) | b3 (H) | b4 (D_IN)]
_B1_OFF = 0
_BHEAD_OFF = _B1_OFF + H          # 128
_B3_OFF = _BHEAD_OFF + 2 * Z      # 384
_B4_OFF = _B3_OFF + H             # 512
_BIAS_LEN = _B4_OFF + D_IN        # 768  (all offsets are 128-lane aligned)


# ------------------------------ Pallas kernel --------------------------------
def vae_kernel(
    x_ref,        # [TM, D_IN]  bf16
    eps_ref,      # [TM, Z]     bf16 standard-normal noise
    w1_ref,       # [D_IN, H]   bf16
    whead_ref,    # [H, 2Z]     bf16  (mu || logvar head)
    w3_ref,       # [Z, H]      bf16
    w4_ref,       # [H, D_IN]   bf16
    bias_ref,     # [1, _BIAS_LEN] f32  (packed b1 | bhead | b3 | b4)
    recon_ref,    # out: [TM, D_IN] bf16
    mu_ref,       # out: [TM, Z]    f32
    logvar_ref,   # out: [TM, Z]    f32
):
    b1 = bias_ref[:, _B1_OFF:_B1_OFF + H]
    bhead = bias_ref[:, _BHEAD_OFF:_BHEAD_OFF + 2 * Z]
    b3 = bias_ref[:, _B3_OFF:_B3_OFF + H]
    b4 = bias_ref[:, _B4_OFF:_B4_OFF + D_IN]

    # ---- encoder hidden: bf16 matmul inputs, f32 accumulation ----
    h = jnp.dot(x_ref[...], w1_ref[...], preferred_element_type=jnp.float32) + b1
    h = jnp.maximum(h, 0.0)  # ReLU (f32)

    # ---- fused mu/logvar head: one [H, 2Z] matmul, slice at lane boundary ----
    head = (
        jnp.dot(h.astype(jnp.bfloat16), whead_ref[...],
                preferred_element_type=jnp.float32)
        + bhead
    )
    mu = head[:, :Z]
    logvar = head[:, Z:]

    # ---- reparameterise (training): z = mu + eps * exp(0.5*logvar), f32 ----
    std = jnp.exp(logvar * 0.5)
    z = eps_ref[...].astype(jnp.float32) * std + mu

    # ---- decoder ----
    dh = (
        jnp.dot(z.astype(jnp.bfloat16), w3_ref[...],
                preferred_element_type=jnp.float32)
        + b3
    )
    dh = jnp.maximum(dh, 0.0)  # ReLU (f32)
    logits = (
        jnp.dot(dh.astype(jnp.bfloat16), w4_ref[...],
                preferred_element_type=jnp.float32)
        + b4
    )
    recon = jax.nn.sigmoid(logits)  # f32 transcendental

    recon_ref[...] = recon.astype(recon_ref.dtype)   # bf16 store, lane-dense
    mu_ref[...] = mu
    logvar_ref[...] = logvar


# ------------------------------ wrapper ---------------------------------------
def _num_tensorcores():
    """Grid steps should equal the number of TensorCores (v7x has 2/chip)."""
    try:
        kind = jax.devices()[0].device_kind.lower()
        if "v7" in kind:
            return 2
    except Exception:
        pass
    return 1


def _resident_spec(shape):
    # Whole-array block; same block index at every grid step -> fetched once,
    # stays VMEM-resident across the batch grid.
    return pl.BlockSpec(shape, lambda i: tuple(0 for _ in shape))


def vae_forward(x_bf16, eps_bf16, params):
    """params = (w1_bf16, whead_bf16, w3_bf16, w4_bf16, bias_packed_f32)."""
    w1, whead, w3, w4, bias_packed = params
    batch, d_in = x_bf16.shape

    nb = _num_tensorcores()
    if batch % nb != 0 or (batch // nb) % 8 != 0:
        nb = 1
    tm = batch // nb

    in_specs = [
        pl.BlockSpec((tm, d_in), lambda i: (i, 0)),   # x: blocked on batch
        pl.BlockSpec((tm, Z), lambda i: (i, 0)),      # eps: blocked on batch
        _resident_spec(w1.shape),
        _resident_spec(whead.shape),
        _resident_spec(w3.shape),
        _resident_spec(w4.shape),
        _resident_spec(bias_packed.shape),
    ]
    out_shape = (
        jax.ShapeDtypeStruct((batch, d_in), jnp.bfloat16),  # reconstruction
        jax.ShapeDtypeStruct((batch, Z), jnp.float32),      # mu
        jax.ShapeDtypeStruct((batch, Z), jnp.float32),      # logvar
    )
    out_specs = (
        pl.BlockSpec((tm, d_in), lambda i: (i, 0)),
        pl.BlockSpec((tm, Z), lambda i: (i, 0)),
        pl.BlockSpec((tm, Z), lambda i: (i, 0)),
    )

    return pl.pallas_call(
        vae_kernel,
        out_shape=out_shape,
        grid=(nb,),
        in_specs=in_specs,
        out_specs=out_specs,
        compiler_params=pltpu.CompilerParams(
            dimension_semantics=("parallel",),  # shards batch across v7x's 2 TCs
        ),
    )(x_bf16, eps_bf16, w1, whead, w3, w4, bias_packed)


# --------------------------- reference (plain JAX) ----------------------------
def vae_forward_ref(x_bf16, eps_bf16, params):
    """Precision-mirrored reference: bf16 matmul inputs, f32 accumulation."""
    w1, whead, w3, w4, bias_packed = params
    b1 = bias_packed[:, _B1_OFF:_B1_OFF + H]
    bhead = bias_packed[:, _BHEAD_OFF:_BHEAD_OFF + 2 * Z]
    b3 = bias_packed[:, _B3_OFF:_B3_OFF + H]
    b4 = bias_packed[:, _B4_OFF:_B4_OFF + D_IN]

    def mm(a, w_bf16):
        return jnp.dot(a.astype(jnp.bfloat16), w_bf16,
                       preferred_element_type=jnp.float32)

    h = jnp.maximum(mm(x_bf16, w1) + b1, 0.0)
    head = mm(h, whead) + bhead
    mu, logvar = head[:, :Z], head[:, Z:]
    z = eps_bf16.astype(jnp.float32) * jnp.exp(0.5 * logvar) + mu
    dh = jnp.maximum(mm(z, w3) + b3, 0.0)
    recon = jax.nn.sigmoid(mm(dh, w4) + b4)
    return recon, mu, logvar


# ------------------------------ main ------------------------------------------
if __name__ == "__main__":
    key = jax.random.PRNGKey(0)
    keys = jax.random.split(key, 8)

    # Deterministic parameter init (synthetic weights, small scale).
    w1 = jax.random.normal(keys[0], (D_IN, H), jnp.float32) * 0.05
    b1 = jnp.zeros((1, H), jnp.float32)
    wmu = jax.random.normal(keys[1], (H, Z), jnp.float32) * 0.05
    bmu = jnp.zeros((1, Z), jnp.float32)
    wlv = jax.random.normal(keys[2], (H, Z), jnp.float32) * 0.05
    blv = jnp.zeros((1, Z), jnp.float32)
    w3 = jax.random.normal(keys[3], (Z, H), jnp.float32) * 0.05
    b3 = jnp.zeros((1, H), jnp.float32)
    w4 = jax.random.normal(keys[4], (H, D_IN), jnp.float32) * 0.05
    b4 = jnp.zeros((1, D_IN), jnp.float32)

    # Fuse mu/logvar heads; bf16 matmul weights; pack all biases into one row.
    whead = jnp.concatenate([wmu, wlv], axis=1)                    # [H, 2Z]
    bhead = jnp.concatenate([bmu, blv], axis=1)                    # [1, 2Z]
    bias_packed = jnp.concatenate([b1, bhead, b3, b4], axis=1)     # [1, 768] f32
    params = (
        w1.astype(jnp.bfloat16),
        whead.astype(jnp.bfloat16),
        w3.astype(jnp.bfloat16),
        w4.astype(jnp.bfloat16),
        bias_packed,
    )

    # Deterministic inputs; x stored bf16 upstream (matmul input precision),
    # eps stored bf16 (reparameterisation noise passed in for determinism).
    x = jax.random.normal(keys[5], (B, D_IN), jnp.float32).astype(jnp.bfloat16)
    eps = jax.random.normal(keys[6], (B, Z), jnp.float32).astype(jnp.bfloat16)

    recon, mu, logvar = vae_forward(x, eps, params)
    jax.block_until_ready((recon, mu, logvar))

    # Cross-check against the precision-mirrored plain-JAX reference.
    r_ref, mu_ref, lv_ref = vae_forward_ref(x, eps, params)
    assert jnp.allclose(recon.astype(jnp.float32), r_ref, atol=1e-2, rtol=1e-2)
    assert jnp.allclose(mu, mu_ref, atol=2e-3, rtol=2e-3)
    assert jnp.allclose(logvar, lv_ref, atol=2e-3, rtol=2e-3)
    assert bool(jnp.all(jnp.isfinite(recon.astype(jnp.float32))))

    print("KERNEL_OK")
</pallas_src>

<mosaic_0001>
module attributes {stable_mosaic.version = 11 : i64} {
  func.func @vae_kernel(%arg0: i32, %arg1: memref<256x256xbf16, #tpu.memory_space<vmem>>, %arg2: memref<256x128xbf16, #tpu.memory_space<vmem>>, %arg3: memref<256x128xbf16, #tpu.memory_space<vmem>>, %arg4: memref<128x256xbf16, #tpu.memory_space<vmem>>, %arg5: memref<128x128xbf16, #tpu.memory_space<vmem>>, %arg6: memref<128x256xbf16, #tpu.memory_space<vmem>>, %arg7: memref<1x768xf32, #tpu.memory_space<vmem>>, %arg8: memref<256x256xbf16, #tpu.memory_space<vmem>>, %arg9: memref<256x128xf32, #tpu.memory_space<vmem>>, %arg10: memref<256x128xf32, #tpu.memory_space<vmem>>) attributes {dimension_semantics = [#tpu.dimension_semantics<parallel>], iteration_bounds = array<i64: 1>, scalar_prefetch = 0 : i64, scratch_operands = 0 : i64, tpu.core_type = #tpu.core_type<tc>, window_params = [{transform_indices = @transform_0, window_bounds = array<i64: 256, 256>}, {transform_indices = @transform_1, window_bounds = array<i64: 256, 128>}, {pipeline_mode = #tpu.pipeline_mode<synchronous>, transform_indices = @transform_2, window_bounds = array<i64: 256, 128>}, {pipeline_mode = #tpu.pipeline_mode<synchronous>, transform_indices = @transform_3, window_bounds = array<i64: 128, 256>}, {pipeline_mode = #tpu.pipeline_mode<synchronous>, transform_indices = @transform_4, window_bounds = array<i64: 128, 128>}, {pipeline_mode = #tpu.pipeline_mode<synchronous>, transform_indices = @transform_5, window_bounds = array<i64: 128, 256>}, {pipeline_mode = #tpu.pipeline_mode<synchronous>, transform_indices = @transform_6, window_bounds = array<i64: 1, 768>}, {transform_indices = @transform_7, window_bounds = array<i64: 256, 256>}, {transform_indices = @transform_8, window_bounds = array<i64: 256, 128>}, {transform_indices = @transform_9, window_bounds = array<i64: 256, 128>}]} {
    %c0 = arith.constant 0 : index
    %c0_0 = arith.constant 0 : index
    %0 = vector.load %arg7[%c0, %c0_0] : memref<1x768xf32, #tpu.memory_space<vmem>>, vector<1x128xf32>
    %c0_1 = arith.constant 0 : index
    %c128 = arith.constant 128 : index
    %1 = vector.load %arg7[%c0_1, %c128] : memref<1x768xf32, #tpu.memory_space<vmem>>, vector<1x256xf32>
    %c0_2 = arith.constant 0 : index
    %c384 = arith.constant 384 : index
    %2 = vector.load %arg7[%c0_2, %c384] : memref<1x768xf32, #tpu.memory_space<vmem>>, vector<1x128xf32>
    %c0_3 = arith.constant 0 : index
    %c512 = arith.constant 512 : index
    %3 = vector.load %arg7[%c0_3, %c512] : memref<1x768xf32, #tpu.memory_space<vmem>>, vector<1x256xf32>
    %c0_4 = arith.constant 0 : index
    %c0_5 = arith.constant 0 : index
    %4 = vector.load %arg1[%c0_4, %c0_5] : memref<256x256xbf16, #tpu.memory_space<vmem>>, vector<256x256xbf16>
    %c0_6 = arith.constant 0 : index
    %c0_7 = arith.constant 0 : index
    %5 = vector.load %arg3[%c0_6, %c0_7] : memref<256x128xbf16, #tpu.memory_space<vmem>>, vector<256x128xbf16>
    %cst = arith.constant dense<0.000000e+00> : vector<256x128xf32>
    %6 = tpu.matmul %4, %5, %cst {dimension_numbers = #tpu.dot_dimension_numbers<[1], [0], [0], [1], [0, 0, 1, 1], [], []>} : vector<256x256xbf16>, vector<256x128xbf16>, vector<256x128xf32> -> vector<256x128xf32>
    %7 = vector.broadcast %0 : vector<1x128xf32> to vector<256x128xf32>
    %8 = arith.addf %6, %7 : vector<256x128xf32>
    %cst_8 = arith.constant 0.000000e+00 : f32
    %9 = vector.broadcast %cst_8 : f32 to vector<256x128xf32>
    %10 = arith.maximumf %8, %9 : vector<256x128xf32>
    %11 = arith.truncf %10 : vector<256x128xf32> to vector<256x128xbf16>
    %c0_9 = arith.constant 0 : index
    %c0_10 = arith.constant 0 : index
    %12 = vector.load %arg4[%c0_9, %c0_10] : memref<128x256xbf16, #tpu.memory_space<vmem>>, vector<128x256xbf16>
    %cst_11 = arith.constant dense<0.000000e+00> : vector<256x256xf32>
    %13 = tpu.matmul %11, %12, %cst_11 {dimension_numbers = #tpu.dot_dimension_numbers<[1], [0], [0], [1], [0, 0, 1, 1], [], []>} : vector<256x128xbf16>, vector<128x256xbf16>, vector<256x256xf32> -> vector<256x256xf32>
    %14 = vector.broadcast %1 : vector<1x256xf32> to vector<256x256xf32>
    %15 = arith.addf %13, %14 : vector<256x256xf32>
    %16 = vector.extract_strided_slice %15 {offsets = [0, 0], sizes = [256, 128], strides = [1, 1]} : vector<256x256xf32> to vector<256x128xf32>
    %17 = vector.extract_strided_slice %15 {offsets = [0, 128], sizes = [256, 128], strides = [1, 1]} : vector<256x256xf32> to vector<256x128xf32>
    %cst_12 = arith.constant 5.000000e-01 : f32
    %18 = vector.broadcast %cst_12 : f32 to vector<256x128xf32>
    %19 = arith.mulf %17, %18 : vector<256x128xf32>
    %20 = math.exp %19 : vector<256x128xf32>
    %c0_13 = arith.constant 0 : index
    %c0_14 = arith.constant 0 : index
    %21 = vector.load %arg2[%c0_13, %c0_14] : memref<256x128xbf16, #tpu.memory_space<vmem>>, vector<256x128xbf16>
    %22 = arith.extf %21 : vector<256x128xbf16> to vector<256x128xf32>
    %23 = arith.mulf %22, %20 : vector<256x128xf32>
    %24 = arith.addf %23, %16 : vector<256x128xf32>
    %25 = arith.truncf %24 : vector<256x128xf32> to vector<256x128xbf16>
    %c0_15 = arith.constant 0 : index
    %c0_16 = arith.constant 0 : index
    %26 = vector.load %arg5[%c0_15, %c0_16] : memref<128x128xbf16, #tpu.memory_space<vmem>>, vector<128x128xbf16>
    %cst_17 = arith.constant dense<0.000000e+00> : vector<256x128xf32>
    %27 = tpu.matmul %25, %26, %cst_17 {dimension_numbers = #tpu.dot_dimension_numbers<[1], [0], [0], [1], [0, 0, 1, 1], [], []>} : vector<256x128xbf16>, vector<128x128xbf16>, vector<256x128xf32> -> vector<256x128xf32>
    %28 = vector.broadcast %2 : vector<1x128xf32> to vector<256x128xf32>
    %29 = arith.addf %27, %28 : vector<256x128xf32>
    %cst_18 = arith.constant 0.000000e+00 : f32
    %30 = vector.broadcast %cst_18 : f32 to vector<256x128xf32>
    %31 = arith.maximumf %29, %30 : vector<256x128xf32>
    %32 = arith.truncf %31 : vector<256x128xf32> to vector<256x128xbf16>
    %c0_19 = arith.constant 0 : index
    %c0_20 = arith.constant 0 : index
    %33 = vector.load %arg6[%c0_19, %c0_20] : memref<128x256xbf16, #tpu.memory_space<vmem>>, vector<128x256xbf16>
    %cst_21 = arith.constant dense<0.000000e+00> : vector<256x256xf32>
    %34 = tpu.matmul %32, %33, %cst_21 {dimension_numbers = #tpu.dot_dimension_numbers<[1], [0], [0], [1], [0, 0, 1, 1], [], []>} : vector<256x128xbf16>, vector<128x256xbf16>, vector<256x256xf32> -> vector<256x256xf32>
    %35 = vector.broadcast %3 : vector<1x256xf32> to vector<256x256xf32>
    %36 = arith.addf %34, %35 : vector<256x256xf32>
    %37 = arith.negf %36 : vector<256x256xf32>
    %38 = math.exp %37 : vector<256x256xf32>
    %cst_22 = arith.constant 1.000000e+00 : f32
    %39 = vector.broadcast %cst_22 : f32 to vector<256x256xf32>
    %40 = arith.addf %39, %38 : vector<256x256xf32>
    %41 = arith.divf %39, %40 : vector<256x256xf32>
    %42 = arith.truncf %41 : vector<256x256xf32> to vector<256x256xbf16>
    %c0_23 = arith.constant 0 : index
    %c0_24 = arith.constant 0 : index
    %43 = vector.load %arg8[%c0_23, %c0_24] : memref<256x256xbf16, #tpu.memory_space<vmem>>, vector<256x256xbf16>
    tpu.vector_store %arg8[%c0_23, %c0_24], %42 {strides = array<i32>} : memref<256x256xbf16, #tpu.memory_space<vmem>>, vector<256x256xbf16>,
    %c0_25 = arith.constant 0 : index
    %c0_26 = arith.constant 0 : index
    %44 = vector.load %arg9[%c0_25, %c0_26] : memref<256x128xf32, #tpu.memory_space<vmem>>, vector<256x128xf32>
    tpu.vector_store %arg9[%c0_25, %c0_26], %16 {strides = array<i32>} : memref<256x128xf32, #tpu.memory_space<vmem>>, vector<256x128xf32>,
    %c0_27 = arith.constant 0 : index
    %c0_28 = arith.constant 0 : index
    %45 = vector.load %arg10[%c0_27, %c0_28] : memref<256x128xf32, #tpu.memory_space<vmem>>, vector<256x128xf32>
    tpu.vector_store %arg10[%c0_27, %c0_28], %17 {strides = array<i32>} : memref<256x128xf32, #tpu.memory_space<vmem>>, vector<256x128xf32>,
    return
  }
  func.func @transform_0(%arg0: i32) -> (i32, i32) {
    %c0_i32 = arith.constant 0 : i32
    %c0_i32_0 = arith.constant 0 : i32
    return %arg0, %c0_i32 : i32, i32
  }
  func.func @transform_1(%arg0: i32) -> (i32, i32) {
    %c0_i32 = arith.constant 0 : i32
    %c0_i32_0 = arith.constant 0 : i32
    return %arg0, %c0_i32 : i32, i32
  }
  func.func @transform_2(%arg0: i32) -> (i32, i32) {
    %c0_i32 = arith.constant 0 : i32
    %c0_i32_0 = arith.constant 0 : i32
    %c0_i32_1 = arith.constant 0 : i32
    return %c0_i32, %c0_i32_0 : i32, i32
  }
  func.func @transform_3(%arg0: i32) -> (i32, i32) {
    %c0_i32 = arith.constant 0 : i32
    %c0_i32_0 = arith.constant 0 : i32
    %c0_i32_1 = arith.constant 0 : i32
    return %c0_i32, %c0_i32_0 : i32, i32
  }
  func.func @transform_4(%arg0: i32) -> (i32, i32) {
    %c0_i32 = arith.constant 0 : i32
    %c0_i32_0 = arith.constant 0 : i32
    %c0_i32_1 = arith.constant 0 : i32
    return %c0_i32, %c0_i32_0 : i32, i32
  }
  func.func @transform_5(%arg0: i32) -> (i32, i32) {
    %c0_i32 = arith.constant 0 : i32
    %c0_i32_0 = arith.constant 0 : i32
    %c0_i32_1 = arith.constant 0 : i32
    return %c0_i32, %c0_i32_0 : i32, i32
  }
  func.func @transform_6(%arg0: i32) -> (i32, i32) {
    %c0_i32 = arith.constant 0 : i32
    %c0_i32_0 = arith.constant 0 : i32
    %c0_i32_1 = arith.constant 0 : i32
    return %c0_i32, %c0_i32_0 : i32, i32
  }
  func.func @transform_7(%arg0: i32) -> (i32, i32) {
    %c0_i32 = arith.constant 0 : i32
    %c0_i32_0 = arith.constant 0 : i32
    return %arg0, %c0_i32 : i32, i32
  }
  func.func @transform_8(%arg0: i32) -> (i32, i32) {
    %c0_i32 = arith.constant 0 : i32
    %c0_i32_0 = arith.constant 0 : i32
    return %arg0, %c0_i32 : i32, i32
  }
  func.func @transform_9(%arg0: i32) -> (i32, i32) {
    %c0_i32 = arith.constant 0 : i32
    %c0_i32_0 = arith.constant 0 : i32
    return %arg0, %c0_i32 : i32, i32
  }
}

</mosaic_0001>

<bundles_post_ra>
// kernel: tpu_custom_call.1
= control target key start
LH: loop header
LB: loop body
LE: loop exit
PB: predicated region body
PF: predicated region fallthrough
CT: control target
= control target key end

     0   :  { %15 = vsyncpa [#allocation3], 0  ;;  %s4132_s0 = inlined_call_operand.hbm [shape: bf16[256,256], index: 0, kind: input, shape index: {}]   ;;  %s4133_s1 = inlined_call_operand.hbm [shape: bf16[256,128], index: 1, kind: input, shape index: {}]   ;;  %s4134_s2 = inlined_call_operand.hbm [shape: bf16[256,128], index: 2, kind: input, shape index: {}]   ;;  %s4135_s3 = inlined_call_operand.hbm [shape: bf16[128,256], index: 3, kind: input, shape index: {}]   ;;  %s4136_s4 = inlined_call_operand.hbm [shape: bf16[128,128], index: 4, kind: input, shape index: {}]   ;;  %s4137_s5 = inlined_call_operand.hbm [shape: bf16[128,256], index: 5, kind: input, shape index: {}]   ;;  %s4138_s6 = inlined_call_operand.vmem [shape: f32[1,768], index: 6, kind: input, shape index: {}]   ;;  %s4139_s7 = inlined_call_operand.hbm [shape: bf16[256,256], index: 7, kind: output, shape index: {0}]   ;;  %s4140_s8 = inlined_call_operand.hbm [shape: f32[256,128], index: 8, kind: output, shape index: {1}]   ;;  %s4141_s9 = inlined_call_operand.hbm [shape: f32[256,128], index: 9, kind: output, shape index: {2}]  }
   0x1   :  { %16 = vsyncpa [#allocation6], 0 }
   0x2   :  { %17 = vsyncpa [#allocation9], 0 }
   0x3   :  { %18 = vsyncpa [#allocation12], 0 }
   0x4   :  { %19 = vsyncpa [#allocation4], 0 }
   0x5   :  { %20 = vsyncpa [#allocation15], 0  ;;  %s3638_s30 = smov [#allocation5]  }
   0x6   :  { %s38_s10 = sshll.u32 %s3638_s30, 4  ;;  %s39_s10 = int_to_ptr.vmem [resolvable:$true] %s38_s10 }
   0x7   :  { %s3454_s11 = scalar_lea.vmem %s39_s10, 2048  ;;  %p3459_p1 = scmp.lt.s32.totalorder %s39_s10, %s39_s10 }
   0x8   :  { %p3455_p0 = scmp.ne.s32.totalorder %s39_s10, %s3454_s11  ;;  %p3460_p2 = scmp.lt.s32.totalorder %s3454_s11, %s3454_s11 }
   0xa   :  { %p3461_p3 = por %p3460_p2, %p3459_p1 }
   0xc   :  { %p3462_p4 = pnand %p3461_p3, %p3455_p0 }
   0xe   :  { %3465 = shalt.err (!%p3462_p4)
}
   0xf   :  { %s3639_s12 = smov 64   ;;  %s3640_s13 = smov 4  }
  0x10   :  { %44 = dma.hbm_to_vmem [thread:$0]  %s4133_s1, 2048, %s39_s10, [#allocation6], %s3639_s12, %s3639_s12, %s3640_s13  }
  0x11   :  { %s3641_s16 = smov [#allocation8]   ;;  %s3642_s18 = smov [#allocation2]  }
  0x12   :  { %s62_s17 = sshll.u32 %s3641_s16, 4  ;;  %s26_s19 = sshll.u32 %s3642_s18, 4  ;;  %s63_s17 = int_to_ptr.vmem [resolvable:$true] %s62_s17  ;;  %s27_s19 = int_to_ptr.vmem [resolvable:$true] %s26_s19 }
  0x13   :  { %s3474_s20 = scalar_lea.vmem %s63_s17, 2048  ;;  %p3479_p6 = scmp.lt.s32.totalorder %s63_s17, %s63_s17 }
  0x14   :  { %p3475_p5 = scmp.ne.s32.totalorder %s63_s17, %s3474_s20  ;;  %p3480_p7 = scmp.lt.s32.totalorder %s3474_s20, %s3474_s20 }
  0x16   :  { %p3481_p8 = por %p3480_p7, %p3479_p6 }
  0x18   :  { %p3482_p9 = pnand %p3481_p8, %p3475_p5 }
  0x1a   :  { %3485 = shalt.err (!%p3482_p9)
}
  0x1b   :  { %s3643_s21 = smov 128   ;;  %s3644_s22 = smov 8  }
  0x1c   :  { %68 = dma.hbm_to_vmem [thread:$0]  %s4135_s3, 2048, %s63_s17, [#allocation9], %s3643_s21, %s3643_s21, %s3644_s22  }
  0x1d   :  { %s3494_s1 = scalar_lea.vmem %s27_s19, 4096  ;;  %p3499_p11 = scmp.lt.s32.totalorder %s27_s19, %s27_s19 }
  0x1e   :  { %p3495_p10 = scmp.ne.s32.totalorder %s27_s19, %s3494_s1  ;;  %p3500_p12 = scmp.lt.s32.totalorder %s3494_s1, %s3494_s1 }
  0x20   :  { %p3501_p13 = por %p3500_p12, %p3499_p11 }
  0x22   :  { %p3502_p0 = pnand %p3501_p13, %p3495_p10 }
  0x24   :  { %3505 = shalt.err (!%p3502_p0)
}
  0x25   :  { %32 = dma.hbm_to_vmem [thread:$0]  %s4132_s0, 4096, %s27_s19, [#allocation3], %s3643_s21, %s3643_s21, %s3644_s22  }
  0x26   :  { %s3645_s27 = smov [#allocation7]   ;;  %s3646_s29 = smov [#allocation10]  }
  0x27   :  { %s50_s28 = sshll.u32 %s3645_s27, 4  ;;  %s74_s3 = sshll.u32 %s3646_s29, 4  ;;  %s51_s28 = int_to_ptr.vmem [resolvable:$true] %s50_s28  ;;  %s75_s3 = int_to_ptr.vmem [resolvable:$true] %s74_s3 }
  0x28   :  { %s3514_s30 = scalar_lea.vmem %s51_s28, 2048  ;;  %p3519_p2 = scmp.lt.s32.totalorder %s51_s28, %s51_s28 }
  0x29   :  { %p3515_p1 = scmp.ne.s32.totalorder %s51_s28, %s3514_s30  ;;  %p3520_p3 = scmp.lt.s32.totalorder %s3514_s30, %s3514_s30 }
  0x2b   :  { %p3521_p4 = por %p3520_p3, %p3519_p2 }
  0x2d   :  { %p3522_p5 = pnand %p3521_p4, %p3515_p1 }
  0x2f   :  { %3525 = shalt.err (!%p3522_p5)
}
  0x30   :  { %56 = dma.hbm_to_vmem [thread:$0]  %s4134_s2, 2048, %s51_s28, [#allocation6], %s3639_s12, %s3639_s12, %s3640_s13  }
  0x31   :  { %s3534_s0 = scalar_lea.vmem %s75_s3, 1024  ;;  %p3539_p7 = scmp.lt.s32.totalorder %s75_s3, %s75_s3 }
  0x32   :  { %p3535_p6 = scmp.ne.s32.totalorder %s75_s3, %s3534_s0  ;;  %p3540_p8 = scmp.lt.s32.totalorder %s3534_s0, %s3534_s0 }
  0x34   :  { %p3541_p9 = por %p3540_p8, %p3539_p7 }
  0x36   :  { %p3542_p10 = pnand %p3541_p9, %p3535_p6 }
  0x38   :  { %3545 = shalt.err (!%p3542_p10)
}
  0x39   :  { %80 = dma.hbm_to_vmem [thread:$0]  %s4136_s4, 1024, %s75_s3, [#allocation9], %s3639_s12, %s3639_s12, %s3640_s13  }
  0x3a   :  { %s3647_s16 = smov [#allocation11]  }
  0x3b   :  { %s86_s17 = sshll.u32 %s3647_s16, 4  ;;  %s87_s17 = int_to_ptr.vmem [resolvable:$true] %s86_s17 }
  0x3c   :  { %s3554_s18 = scalar_lea.vmem %s87_s17, 2048  ;;  %p3559_p12 = scmp.lt.s32.totalorder %s87_s17, %s87_s17 }
  0x3d   :  { %p3555_p11 = scmp.ne.s32.totalorder %s87_s17, %s3554_s18  ;;  %p3560_p13 = scmp.lt.s32.totalorder %s3554_s18, %s3554_s18 }
  0x3f   :  { %p3561_p0 = por %p3560_p13, %p3559_p12 }
  0x41   :  { %p3562_p1 = pnand %p3561_p0, %p3555_p11 }
  0x43   :  { %3565 = shalt.err (!%p3562_p1)
}
  0x44   :  { %92 = dma.hbm_to_vmem [thread:$0]  %s4137_s5, 2048, %s87_s17, [#allocation12], %s3643_s21, %s3643_s21, %s3644_s22  }
  0x45   :  { %3626 = dma.done.wait [#allocation3], 4096  }
  0x46   :  { %3627 = vsyncadd [#allocation3], 4294963200 }
  0x47   :  { %3628 = dma.done.wait [#allocation6], 4096  }
  0x48   :  { %3629 = vsyncadd [#allocation6], 4294963200 }
  0x49   :  { %3630 = dma.done.wait [#allocation9], 3072  }
  0x4a   :  { %3631 = vsyncadd [#allocation9], 4294964224 }
  0x4b   :  { %3632 = dma.done.wait [#allocation12], 2048  }
  0x4c   :  { %3633 = vsyncadd [#allocation12], 4294965248  ;;  %v3006_v0 = vld [vmem:[#allocation7 + $0x78] sm:$0xff]   ;;  %v3008_v2 = vld [vmem:[#allocation7 + $0x70] sm:$0xff]   ;;  %v3648_v55 = vmov 0  }
  0x4d   :  { %v3007_v1 = vld [vmem:[#allocation7 + $0x38] sm:$0xff]   ;;  %2792 = vmatprep.subr.bf16.mxu0 %v3006_v0  ;;  %v3009_v3 = vld [vmem:[#allocation7 + $0x30] sm:$0xff]   ;;  %v3010_v4 = vld [vmem:[#allocation7 + $0x68] sm:$0xff]   ;;  %832 = vmatprep.mubr.bf16.mxu1 %v3648_v55 }
  0x4e   :  { %2793 = vmatpush3.bf16.msra.mxu0 %v3007_v1  ;;  %v3011_v5 = vld [vmem:[#allocation7 + $0x28] sm:$0xff]   ;;  %v3012_v6 = vld [vmem:[#allocation7 + $0x60] sm:$0xff]   ;;  %v3014_v8 = vld [vmem:[#allocation7 + $0x58] sm:$0xff]  }
  0x4f   :  { %2794 = vmatprep.subr.bf16.mxu0 %v3008_v2  ;;  %v3013_v7 = vld [vmem:[#allocation7 + $0x20] sm:$0xff]   ;;  %v3015_v9 = vld [vmem:[#allocation7 + $0x18] sm:$0xff]   ;;  %v3016_v10 = vld [vmem:[#allocation7 + $0x50] sm:$0xff]  }
  0x50   :  { %v3024_v11 = vld [vmem:[#allocation2 + $0x4] ss:$8 sps:$4 sm:$0xff]   ;;  %v3017_v12 = vld [vmem:[#allocation7 + $0x10] sm:$0xff]   ;;  %v3022_v17 = vld [vmem:[#allocation2] ss:$8 sps:$4 sm:$0xff]  }
  0x51   :  { %476 = vmatprep.mubr.bf16.mxu0 %v3024_v11  ;;  %v3018_v13 = vld [vmem:[#allocation7 + $0x48] sm:$0xff]   ;;  %v3020_v15 = vld [vmem:[#allocation7 + $0x40] sm:$0xff]   ;;  %v3054_v18 = vld [vmem:[#allocation8 + $0x74] ss:$8 sps:$4 sm:$0xff]  }
  0x52   :  { %2795 = vmatpush3.bf16.msra.mxu0 %v3009_v3  ;;  %v3019_v14 = vld [vmem:[#allocation7 + $0x8] sm:$0xff]   ;;  %v3021_v16 = vld [vmem:[#allocation7] sm:$0xff]   ;;  %v3025_v19 = vld [vmem:[#allocation2 + $0x14] ss:$8 sps:$4 sm:$0xff]   ;;  %2976 = vmatprep.subr.bf16.mxu1 %v3054_v18 }
  0x53   :  { %2796 = vmatprep.subr.bf16.mxu0 %v3010_v4  ;;  %v3052_v20 = vld [vmem:[#allocation8 + $0x70] ss:$8 sps:$4 sm:$0xff]   ;;  %v3063_v21 = vld [vmem:[#allocation8 + $0x64] ss:$8 sps:$4 sm:$0xff]   ;;  %v3061_v22 = vld [vmem:[#allocation8 + $0x60] ss:$8 sps:$4 sm:$0xff]  }
  0x54   :  { %2984 = vmatpush1.bf16.msra.mxu1 %v3052_v20  ;;  %v3027_v23 = vld [vmem:[#allocation2 + $0x10] ss:$8 sps:$4 sm:$0xff]   ;;  %v3072_v24 = vld [vmem:[#allocation8 + $0x54] ss:$8 sps:$4 sm:$0xff]   ;;  %v3028_v25 = vld [vmem:[#allocation2 + $0x24] ss:$8 sps:$4 sm:$0xff]  }
  0x55   :  { %2977 = vmatprep.subr.bf16.mxu1 %v3063_v21  ;;  %v3070_v26 = vld [vmem:[#allocation8 + $0x50] ss:$8 sps:$4 sm:$0xff]   ;;  %v3081_v27 = vld [vmem:[#allocation8 + $0x44] ss:$8 sps:$4 sm:$0xff]   ;;  %v3079_v28 = vld [vmem:[#allocation8 + $0x40] ss:$8 sps:$4 sm:$0xff]  }
  0x56   :  { %2797 = vmatpush3.bf16.msra.mxu0 %v3011_v5  ;;  %v3084_v29 = vld [vmem:[#allocation8 + $0x34] ss:$8 sps:$4 sm:$0xff]   ;;  %v3030_v30 = vld [vmem:[#allocation2 + $0x20] ss:$8 sps:$4 sm:$0xff]   ;;  %v3082_v32 = vld [vmem:[#allocation8 + $0x30] ss:$8 sps:$4 sm:$0xff]  }
  0x57   :  { %2798 = vmatprep.subr.bf16.mxu0 %v3012_v6  ;;  %v3031_v31 = vld [vmem:[#allocation2 + $0x34] ss:$8 sps:$4 sm:$0xff]   ;;  %v3087_v33 = vld [vmem:[#allocation8 + $0x24] ss:$8 sps:$4 sm:$0xff]   ;;  %v3085_v34 = vld [vmem:[#allocation8 + $0x20] ss:$8 sps:$4 sm:$0xff]  }
  0x58   :  { %2985 = vmatpush1.bf16.msra.mxu1 %v3061_v22  ;;  %v3090_v35 = vld [vmem:[#allocation8 + $0x14] ss:$8 sps:$4 sm:$0xff]   ;;  %v3033_v36 = vld [vmem:[#allocation2 + $0x30] ss:$8 sps:$4 sm:$0xff]   ;;  %v3034_v37 = vld [vmem:[#allocation2 + $0x44] ss:$8 sps:$4 sm:$0xff]  }
  0x59   :  { %2978 = vmatprep.subr.bf16.mxu1 %v3072_v24  ;;  %v3088_v38 = vld [vmem:[#allocation8 + $0x10] ss:$8 sps:$4 sm:$0xff]   ;;  %v3093_v39 = vld [vmem:[#allocation8 + $0x4] ss:$8 sps:$4 sm:$0xff]   ;;  %v3091_v40 = vld [vmem:[#allocation8] ss:$8 sps:$4 sm:$0xff]  }
  0x5a   :  { %2799 = vmatpush3.bf16.msra.mxu0 %v3013_v7  ;;  %v3036_v41 = vld [vmem:[#allocation2 + $0x40] ss:$8 sps:$4 sm:$0xff]   ;;  %v3037_v42 = vld [vmem:[#allocation2 + $0x54] ss:$8 sps:$4 sm:$0xff]   ;;  %v3039_v43 = vld [vmem:[#allocation2 + $0x50] ss:$8 sps:$4 sm:$0xff]  }
  0x5b   :  { %2800 = vmatprep.subr.bf16.mxu0 %v3014_v8  ;;  %v3040_v44 = vld [vmem:[#allocation2 + $0x64] ss:$8 sps:$4 sm:$0xff]   ;;  %v3042_v45 = vld [vmem:[#allocation2 + $0x60] ss:$8 sps:$4 sm:$0xff]   ;;  %v3043_v46 = vld [vmem:[#allocation2 + $0x74] ss:$8 sps:$4 sm:$0xff]  }
  0x5c   :  { %2986 = vmatpush1.bf16.msra.mxu1 %v3070_v26  ;;  %v3045_v47 = vld [vmem:[#allocation2 + $0x70] ss:$8 sps:$4 sm:$0xff]   ;;  %v3046_v48 = vld [vmem:[#allocation2 + $0x84] ss:$8 sps:$4 sm:$0xff]   ;;  %v3048_v49 = vld [vmem:[#allocation2 + $0x80] ss:$8 sps:$4 sm:$0xff]  }
  0x5d   :  { %2979 = vmatprep.subr.bf16.mxu1 %v3081_v27  ;;  %v3049_v50 = vld [vmem:[#allocation2 + $0x94] ss:$8 sps:$4 sm:$0xff]   ;;  %v3051_v51 = vld [vmem:[#allocation2 + $0x90] ss:$8 sps:$4 sm:$0xff]   ;;  %v3055_v52 = vld [vmem:[#allocation2 + $0xa4] ss:$8 sps:$4 sm:$0xff]  }
  0x5e   :  { %2801 = vmatpush3.bf16.msra.mxu0 %v3015_v9  ;;  %v3057_v53 = vld [vmem:[#allocation2 + $0xa0] ss:$8 sps:$4 sm:$0xff]   ;;  %v3058_v54 = vld [vmem:[#allocation2 + $0xb4] ss:$8 sps:$4 sm:$0xff]   ;;  %v3060_v56 = vld [vmem:[#allocation2 + $0xb0] ss:$8 sps:$4 sm:$0xff]  }
  0x5f   :  { %2802 = vmatprep.subr.bf16.mxu0 %v3016_v10  ;;  %v3064_v57 = vld [vmem:[#allocation2 + $0xc4] ss:$8 sps:$4 sm:$0xff]   ;;  %v3066_v58 = vld [vmem:[#allocation2 + $0xc0] ss:$8 sps:$4 sm:$0xff]   ;;  %v3067_v59 = vld [vmem:[#allocation2 + $0xd4] ss:$8 sps:$4 sm:$0xff]  }
  0x60   :  { %2987 = vmatpush1.bf16.msra.mxu1 %v3079_v28  ;;  %v3069_v60 = vld [vmem:[#allocation2 + $0xd0] ss:$8 sps:$4 sm:$0xff]   ;;  %v3073_v61 = vld [vmem:[#allocation2 + $0xe4] ss:$8 sps:$4 sm:$0xff]   ;;  %v3075_v62 = vld [vmem:[#allocation2 + $0xe0] ss:$8 sps:$4 sm:$0xff]  }
  0x61   :  { %2980 = vmatprep.subr.bf16.mxu1 %v3084_v29  ;;  %v3076_v63 = vld [vmem:[#allocation2 + $0xf4] ss:$8 sps:$4 sm:$0xff]   ;;  %v3078_v0 = vld [vmem:[#allocation2 + $0xf0] ss:$8 sps:$4 sm:$0xff]   ;;  %v3743_v4 = vld [vmem:[%s4138_s6] ss:$0 sm:$0xff] }
  0x62   :  { %2803 = vmatpush3.bf16.msra.mxu0 %v3017_v12 }
  0x63   :  { %2804 = vmatprep.subr.bf16.mxu0 %v3018_v13 }
  0x64   :  { %2988 = vmatpush1.bf16.msra.mxu1 %v3082_v32 }
  0x65   :  { %2981 = vmatprep.subr.bf16.mxu1 %v3087_v33 }
  0x66   :  { %2805 = vmatpush3.bf16.msra.mxu0 %v3019_v14 }
  0x67   :  { %2806 = vmatprep.subr.bf16.mxu0 %v3020_v15 }
  0x68   :  { %2989 = vmatpush1.bf16.msra.mxu1 %v3085_v34 }
  0x69   :  { %2982 = vmatprep.subr.bf16.mxu1 %v3090_v35 }
  0x6a   :  { %2807 = vmatpush3.bf16.msra.mxu0 %v3021_v16 }
  0x6b   :  { %760 = vmatprep.subr.bf16.mxu0 %v3054_v18 }
  0x6c   :  { %2990 = vmatpush1.bf16.msra.mxu1 %v3088_v38 }
  0x6d   :  { %477 = vmatmul.mubr.bf16.vlgmr.msra.gmra.mxu0 %v3022_v17  ;;  %2983 = vmatprep.subr.bf16.mxu1 %v3093_v39 }
  0x6e   :  { %484 = vmatprep.mubr.bf16.mxu0 %v3025_v19  ;;  %761 = vmatpush1.bf16.msra.mxu0 %v3052_v20 }
  0x6f   :  { %762 = vmatprep.subr.bf16.mxu0 %v3063_v21 }
  0x70   :  { %2991 = vmatpush1.bf16.msra.mxu1 %v3091_v40 }
  0x72   :  { %763 = vmatpush1.bf16.msra.mxu0 %v3061_v22 }
  0x73   :  { %764 = vmatprep.subr.bf16.mxu0 %v3072_v24 }
  0x75   :  { %485 = vmatmul.mubr.bf16.gmra.mxu0 %v3027_v23 }
  0x76   :  { %492 = vmatprep.mubr.bf16.mxu0 %v3028_v25  ;;  %765 = vmatpush1.bf16.msra.mxu0 %v3070_v26 }
  0x77   :  { %766 = vmatprep.subr.bf16.mxu0 %v3081_v27 }
  0x7a   :  { %767 = vmatpush1.bf16.msra.mxu0 %v3079_v28 }
  0x7b   :  { %768 = vmatprep.subr.bf16.mxu0 %v3084_v29 }
  0x7d   :  { %493 = vmatmul.mubr.bf16.gmra.mxu0 %v3030_v30 }
  0x7e   :  { %500 = vmatprep.mubr.bf16.mxu0 %v3031_v31  ;;  %769 = vmatpush1.bf16.msra.mxu0 %v3082_v32 }
  0x7f   :  { %770 = vmatprep.subr.bf16.mxu0 %v3087_v33 }
  0x82   :  { %771 = vmatpush1.bf16.msra.mxu0 %v3085_v34 }
  0x83   :  { %772 = vmatprep.subr.bf16.mxu0 %v3090_v35 }
  0x85   :  { %501 = vmatmul.mubr.bf16.gmra.mxu0 %v3033_v36 }
  0x86   :  { %508 = vmatprep.mubr.bf16.mxu0 %v3034_v37  ;;  %773 = vmatpush1.bf16.msra.mxu0 %v3088_v38 }
  0x87   :  { %774 = vmatprep.subr.bf16.mxu0 %v3093_v39 }
  0x8a   :  { %775 = vmatpush1.bf16.msra.mxu0 %v3091_v40 }
  0x8d   :  { %509 = vmatmul.mubr.bf16.gmra.mxu0 %v3036_v41 }
  0x8e   :  { %516 = vmatprep.mubr.bf16.mxu0 %v3037_v42 }
  0x95   :  { %517 = vmatmul.mubr.bf16.gmra.mxu0 %v3039_v43 }
  0x96   :  { %524 = vmatprep.mubr.bf16.mxu0 %v3040_v44 }
  0x9d   :  { %525 = vmatmul.mubr.bf16.gmra.mxu0 %v3042_v45 }
  0x9e   :  { %532 = vmatprep.mubr.bf16.mxu0 %v3043_v46 }
  0xa5   :  { %533 = vmatmul.mubr.bf16.gmra.mxu0 %v3045_v47 }
  0xa6   :  { %540 = vmatprep.mubr.bf16.mxu0 %v3046_v48 }
  0xad   :  { %541 = vmatmul.mubr.bf16.gmra.mxu0 %v3048_v49 }
  0xae   :  { %548 = vmatprep.mubr.bf16.mxu0 %v3049_v50 }
  0xb5   :  { %549 = vmatmul.mubr.bf16.gmra.mxu0 %v3051_v51 }
  0xb6   :  { %556 = vmatprep.mubr.bf16.mxu0 %v3055_v52 }
  0xbd   :  { %557 = vmatmul.mubr.bf16.gmra.mxu0 %v3057_v53 }
  0xbe   :  { %564 = vmatprep.mubr.bf16.mxu0 %v3058_v54 }
  0xc5   :  { %565 = vmatmul.mubr.bf16.gmra.mxu0 %v3060_v56 }
  0xc6   :  { %572 = vmatprep.mubr.bf16.mxu0 %v3064_v57 }
  0xcd   :  { %573 = vmatmul.mubr.bf16.gmra.mxu0 %v3066_v58 }
  0xce   :  { %580 = vmatprep.mubr.bf16.mxu0 %v3067_v59 }
  0xd5   :  { %581 = vmatmul.mubr.bf16.gmra.mxu0 %v3069_v60 }
  0xd6   :  { %588 = vmatprep.mubr.bf16.mxu0 %v3073_v61 }
  0xdd   :  { %589 = vmatmul.mubr.bf16.gmra.mxu0 %v3075_v62 }
  0xde   :  { %596 = vmatprep.mubr.bf16.mxu0 %v3076_v63 }
  0xe5   :  { %597 = vmatmul.mubr.bf16.gmra.mxu0 %v3078_v0 }
  0xe6   :  { %792 = vmatprep.mubr.bf16.mxu0 %v3648_v55 }
 0x12d   :  { %v2808_v1 = vpop.f32.mrf.mxu0 }
 0x12f   :  { %v2809_v2 = vpop.f32.mrf.mxu0 }
 0x130   :  { %v2810_v3 = vadd.f32 %v2809_v2, %v2808_v1 }
 0x131   :  { %v2811_v5 = vpop.f32.mrf.mxu0 }
 0x132   :  { %v479_v7 = vadd.f32 %v2810_v3, %v3743_v4 }
 0x133   :  { %v2812_v6 = vpop.f32.mrf.mxu0 }
 0x134   :  { %v2813_v8 = vadd.f32 %v2812_v6, %v2811_v5  ;;  %v605_v12 = vmax.f32 %v479_v7, 0.0 }
 0x135   :  { %v2814_v9 = vpop.f32.mrf.mxu0 }
 0x136   :  { %v482_v10 = vadd.f32 %v2813_v8, %v3743_v4 }
 0x137   :  { %v2815_v11 = vpop.f32.mrf.mxu0 }
 0x138   :  { %v606_v13 = vmax.f32 %v482_v10, 0.0  ;;  %v2816_v14 = vadd.f32 %v2815_v11, %v2814_v9 }
 0x139   :  { %v2817_v15 = vpop.f32.mrf.mxu0 }
 0x13a   :  { %v637_v16 = vpack.c.bf16 %v606_v13, %v605_v12  ;;  %v487_v18 = vadd.f32 %v2816_v14, %v3743_v4 }
 0x13b   :  { %v2818_v17 = vpop.f32.mrf.mxu0 }
 0x13c   :  { %v2819_v19 = vadd.f32 %v2818_v17, %v2817_v15  ;;  %793 = vmatmul.mubr.bf16.vlgmr.msra.gmra.mxu0 %v637_v16  ;;  %v607_v23 = vmax.f32 %v487_v18, 0.0 }
 0x13d   :  { %v2820_v20 = vpop.f32.mrf.mxu0  ;;  %802 = vmatprep.mubr.bf16.mxu0 %v3648_v55 }
 0x13e   :  { %v490_v21 = vadd.f32 %v2819_v19, %v3743_v4 }
 0x13f   :  { %v2821_v22 = vpop.f32.mrf.mxu0 }
 0x140   :  { %v608_v24 = vmax.f32 %v490_v21, 0.0  ;;  %v2822_v25 = vadd.f32 %v2821_v22, %v2820_v20 }
 0x141   :  { %v2823_v26 = vpop.f32.mrf.mxu0 }
 0x142   :  { %v638_v27 = vpack.c.bf16 %v608_v24, %v607_v23  ;;  %v495_v29 = vadd.f32 %v2822_v25, %v3743_v4 }
 0x143   :  { %v2824_v28 = vpop.f32.mrf.mxu0 }
 0x144   :  { %v2825_v30 = vadd.f32 %v2824_v28, %v2823_v26  ;;  %803 = vmatmul.mubr.bf16.gmra.mxu0 %v638_v27  ;;  %v609_v34 = vmax.f32 %v495_v29, 0.0 }
 0x145   :  { %v2826_v31 = vpop.f32.mrf.mxu0  ;;  %812 = vmatprep.mubr.bf16.mxu0 %v3648_v55 }
 0x146   :  { %v498_v32 = vadd.f32 %v2825_v30, %v3743_v4 }
 0x147   :  { %v2827_v33 = vpop.f32.mrf.mxu0 }
 0x148   :  { %v610_v35 = vmax.f32 %v498_v32, 0.0  ;;  %v2828_v36 = vadd.f32 %v2827_v33, %v2826_v31 }
 0x149   :  { %v2829_v37 = vpop.f32.mrf.mxu0 }
 0x14a   :  { %v639_v38 = vpack.c.bf16 %v610_v35, %v609_v34  ;;  %v503_v40 = vadd.f32 %v2828_v36, %v3743_v4 }
 0x14b   :  { %v2830_v39 = vpop.f32.mrf.mxu0 }
 0x14c   :  { %v2831_v41 = vadd.f32 %v2830_v39, %v2829_v37  ;;  %813 = vmatmul.mubr.bf16.gmra.mxu0 %v639_v38  ;;  %v611_v45 = vmax.f32 %v503_v40, 0.0 }
 0x14d   :  { %v2832_v42 = vpop.f32.mrf.mxu0  ;;  %822 = vmatprep.mubr.bf16.mxu0 %v3648_v55 }
 0x14e   :  { %v506_v43 = vadd.f32 %v2831_v41, %v3743_v4 }
 0x14f   :  { %v2833_v44 = vpop.f32.mrf.mxu0 }
 0x150   :  { %v612_v46 = vmax.f32 %v506_v43, 0.0  ;;  %v2834_v47 = vadd.f32 %v2833_v44, %v2832_v42 }
 0x151   :  { %v2835_v48 = vpop.f32.mrf.mxu0 }
 0x152   :  { %v640_v49 = vpack.c.bf16 %v612_v46, %v611_v45  ;;  %v511_v51 = vadd.f32 %v2834_v47, %v3743_v4 }
 0x153   :  { %v2836_v50 = vpop.f32.mrf.mxu0 }
 0x154   :  { %v2837_v52 = vadd.f32 %v2836_v50, %v2835_v48  ;;  %823 = vmatmul.mubr.bf16.gmra.mxu0 %v640_v49  ;;  %v613_v57 = vmax.f32 %v511_v51, 0.0 }
 0x155   :  { %v2838_v53 = vpop.f32.mrf.mxu0 }
 0x156   :  { %v514_v54 = vadd.f32 %v2837_v52, %v3743_v4 }
 0x157   :  { %v2839_v56 = vpop.f32.mrf.mxu0 }
 0x158   :  { %v614_v58 = vmax.f32 %v514_v54, 0.0  ;;  %v2840_v59 = vadd.f32 %v2839_v56, %v2838_v53  ;;  %v3094_v56 = vld [vmem:[#allocation10 + $0x38] sm:$0xff]  }
 0x159   :  { %v2841_v60 = vpop.f32.mrf.mxu0  ;;  %2928 = vmatprep.subr.bf16.mxu0 %v3094_v56 }
 0x15a   :  { %v641_v61 = vpack.c.bf16 %v614_v58, %v613_v57  ;;  %v519_v63 = vadd.f32 %v2840_v59, %v3743_v4  ;;  %2929 = vmatpush3.bf16.msra.mxu0 %v3094_v56 }
 0x15b   :  { %v2842_v62 = vpop.f32.mrf.mxu0 }
 0x15c   :  { %v2843_v0 = vadd.f32 %v2842_v62, %v2841_v60  ;;  %833 = vmatmul.mubr.bf16.vlgmr.msra.gmra.mxu1 %v641_v61  ;;  %v615_v5 = vmax.f32 %v519_v63, 0.0  ;;  %v3095_v62 = vld [vmem:[#allocation10 + $0x30] sm:$0xff]  }
 0x15d   :  { %v2844_v1 = vpop.f32.mrf.mxu0  ;;  %842 = vmatprep.mubr.bf16.mxu1 %v3648_v55  ;;  %2930 = vmatprep.subr.bf16.mxu0 %v3095_v62 }
 0x15e   :  { %v522_v2 = vadd.f32 %v2843_v0, %v3743_v4  ;;  %2931 = vmatpush3.bf16.msra.mxu0 %v3095_v62 }
 0x15f   :  { %v2845_v3 = vpop.f32.mrf.mxu0 }
 0x160   :  { %v616_v6 = vmax.f32 %v522_v2, 0.0  ;;  %v2846_v7 = vadd.f32 %v2845_v3, %v2844_v1 }
 0x161   :  { %v2847_v8 = vpop.f32.mrf.mxu0 }
 0x162   :  { %v642_v9 = vpack.c.bf16 %v616_v6, %v615_v5  ;;  %v527_v11 = vadd.f32 %v2846_v7, %v3743_v4  ;;  %v3096_v6 = vld [vmem:[#allocation10 + $0x28] sm:$0xff]  }
 0x163   :  { %v2848_v10 = vpop.f32.mrf.mxu0  ;;  %2932 = vmatprep.subr.bf16.mxu0 %v3096_v6 }
 0x164   :  { %v2849_v12 = vadd.f32 %v2848_v10, %v2847_v8  ;;  %843 = vmatmul.mubr.bf16.gmra.mxu1 %v642_v9  ;;  %v617_v16 = vmax.f32 %v527_v11, 0.0  ;;  %2933 = vmatpush3.bf16.msra.mxu0 %v3096_v6 }
 0x165   :  { %v2850_v13 = vpop.f32.mrf.mxu0  ;;  %852 = vmatprep.mubr.bf16.mxu1 %v3648_v55 }
 0x166   :  { %v530_v14 = vadd.f32 %v2849_v12, %v3743_v4  ;;  %v3097_v12 = vld [vmem:[#allocation10 + $0x20] sm:$0xff]  }
 0x167   :  { %v2851_v15 = vpop.f32.mrf.mxu0  ;;  %2934 = vmatprep.subr.bf16.mxu0 %v3097_v12 }
 0x168   :  { %v618_v17 = vmax.f32 %v530_v14, 0.0  ;;  %v2852_v18 = vadd.f32 %v2851_v15, %v2850_v13  ;;  %2935 = vmatpush3.bf16.msra.mxu0 %v3097_v12 }
 0x169   :  { %v2853_v19 = vpop.f32.mrf.mxu0 }
 0x16a   :  { %v643_v20 = vpack.c.bf16 %v618_v17, %v617_v16  ;;  %v535_v22 = vadd.f32 %v2852_v18, %v3743_v4 }
 0x16b   :  { %v2854_v21 = vpop.f32.mrf.mxu0 }
 0x16c   :  { %v2855_v23 = vadd.f32 %v2854_v21, %v2853_v19  ;;  %853 = vmatmul.mubr.bf16.gmra.mxu1 %v643_v20  ;;  %v619_v27 = vmax.f32 %v535_v22, 0.0  ;;  %v3098_v19 = vld [vmem:[#allocation10 + $0x18] sm:$0xff]  }
 0x16d   :  { %v2856_v24 = vpop.f32.mrf.mxu0  ;;  %862 = vmatprep.mubr.bf16.mxu1 %v3648_v55  ;;  %2936 = vmatprep.subr.bf16.mxu0 %v3098_v19 }
 0x16e   :  { %v538_v25 = vadd.f32 %v2855_v23, %v3743_v4  ;;  %2937 = vmatpush3.bf16.msra.mxu0 %v3098_v19 }
 0x16f   :  { %v2857_v26 = vpop.f32.mrf.mxu0 }
 0x170   :  { %v620_v28 = vmax.f32 %v538_v25, 0.0  ;;  %v2858_v29 = vadd.f32 %v2857_v26, %v2856_v24  ;;  %v3099_v25 = vld [vmem:[#allocation10 + $0x10] sm:$0xff]  }
 0x171   :  { %v2859_v30 = vpop.f32.mrf.mxu0  ;;  %2938 = vmatprep.subr.bf16.mxu0 %v3099_v25 }
 0x172   :  { %v644_v31 = vpack.c.bf16 %v620_v28, %v619_v27  ;;  %v543_v33 = vadd.f32 %v2858_v29, %v3743_v4  ;;  %2939 = vmatpush3.bf16.msra.mxu0 %v3099_v25 }
 0x173   :  { %v2860_v32 = vpop.f32.mrf.mxu0 }
 0x174   :  { %v2861_v34 = vadd.f32 %v2860_v32, %v2859_v30  ;;  %863 = vmatmul.mubr.bf16.gmra.mxu1 %v644_v31  ;;  %v621_v38 = vmax.f32 %v543_v33, 0.0  ;;  %v3100_v32 = vld [vmem:[#allocation10 + $0x8] sm:$0xff]  }
 0x175   :  { %v2862_v35 = vpop.f32.mrf.mxu0  ;;  %872 = vmatprep.mubr.bf16.mxu1 %v3648_v55  ;;  %2940 = vmatprep.subr.bf16.mxu0 %v3100_v32 }
 0x176   :  { %v546_v36 = vadd.f32 %v2861_v34, %v3743_v4  ;;  %2941 = vmatpush3.bf16.msra.mxu0 %v3100_v32  ;;  %v3102_v32 = vld [vmem:[#allocation11 + $0x70] ss:$8 sps:$4 sm:$0xff]  }
 0x177   :  { %v2863_v37 = vpop.f32.mrf.mxu0 }
 0x178   :  { %v622_v39 = vmax.f32 %v546_v36, 0.0  ;;  %v2864_v40 = vadd.f32 %v2863_v37, %v2862_v35 }
 0x179   :  { %v2865_v41 = vpop.f32.mrf.mxu0 }
 0x17a   :  { %v645_v42 = vpack.c.bf16 %v622_v39, %v621_v38  ;;  %v551_v44 = vadd.f32 %v2864_v40, %v3743_v4  ;;  %v3101_v38 = vld [vmem:[#allocation10] sm:$0xff]  }
 0x17b   :  { %v2866_v43 = vpop.f32.mrf.mxu0  ;;  %2942 = vmatprep.subr.bf16.mxu0 %v3101_v38 }
 0x17c   :  { %v2867_v45 = vadd.f32 %v2866_v43, %v2865_v41  ;;  %873 = vmatmul.mubr.bf16.gmra.mxu1 %v645_v42  ;;  %v623_v49 = vmax.f32 %v551_v44, 0.0  ;;  %2943 = vmatpush3.bf16.msra.mxu0 %v3101_v38 }
 0x17d   :  { %v2868_v46 = vpop.f32.mrf.mxu0  ;;  %882 = vmatprep.mubr.bf16.mxu1 %v3648_v55 }
 0x17e   :  { %v554_v47 = vadd.f32 %v2867_v45, %v3743_v4 }
 0x17f   :  { %v2869_v48 = vpop.f32.mrf.mxu0 }
 0x180   :  { %v624_v50 = vmax.f32 %v554_v47, 0.0  ;;  %v2870_v51 = vadd.f32 %v2869_v48, %v2868_v46 }
 0x181   :  { %v2871_v52 = vpop.f32.mrf.mxu0 }
 0x182   :  { %v646_v53 = vpack.c.bf16 %v624_v50, %v623_v49  ;;  %v559_v57 = vadd.f32 %v2870_v51, %v3743_v4 }
 0x183   :  { %v2872_v54 = vpop.f32.mrf.mxu0 }
 0x184   :  { %v2873_v58 = vadd.f32 %v2872_v54, %v2871_v52  ;;  %883 = vmatmul.mubr.bf16.gmra.mxu1 %v646_v53  ;;  %v625_v63 = vmax.f32 %v559_v57, 0.0 }
 0x185   :  { %v2874_v59 = vpop.f32.mrf.mxu0  ;;  %892 = vmatprep.mubr.bf16.mxu1 %v3648_v55 }
 0x186   :  { %v562_v60 = vadd.f32 %v2873_v58, %v3743_v4 }
 0x187   :  { %v2875_v61 = vpop.f32.mrf.mxu0 }
 0x188   :  { %v626_v0 = vmax.f32 %v562_v60, 0.0  ;;  %v2876_v1 = vadd.f32 %v2875_v61, %v2874_v59 }
 0x189   :  { %v2877_v2 = vpop.f32.mrf.mxu0 }
 0x18a   :  { %v647_v3 = vpack.c.bf16 %v626_v0, %v625_v63  ;;  %v567_v7 = vadd.f32 %v2876_v1, %v3743_v4  ;;  %v670_v63 = vlaneseq }
 0x18b   :  { %v2878_v5 = vpop.f32.mrf.mxu0 }
 0x18c   :  { %v2879_v8 = vadd.f32 %v2878_v5, %v2877_v2  ;;  %893 = vmatmul.mubr.bf16.gmra.mxu1 %v647_v3  ;;  %v627_v13 = vmax.f32 %v567_v7, 0.0  ;;  %v3792_v0 = vshrl.u32 %v670_v63, 7  ;;  %v115_v2 = vld [vmem:[%s4138_s6 + $0x1] sm:$0x3]  ;;  %v3108_v63 = vld [vmem:[#allocation11 + $0x50] ss:$8 sps:$4 sm:$0xff]  }
 0x18d   :  { %v2880_v9 = vpop.f32.mrf.mxu0  ;;  %902 = vmatprep.mubr.bf16.mxu1 %v3648_v55 }
 0x18e   :  { %v570_v10 = vadd.f32 %v2879_v8, %v3743_v4  ;;  %v672_v1 = vsub.s32 0, %v3792_v0  ;;  %v676_v3 = vsub.s32 1, %v3792_v0 }
 0x18f   :  { %v2881_v11 = vpop.f32.mrf.mxu0 }
 0x190   :  { %v628_v14 = vmax.f32 %v570_v10, 0.0  ;;  %v2882_v15 = vadd.f32 %v2881_v11, %v2880_v9  ;;  %v3805_v5 = vrot.slane %v115_v2, %v676_v3 }
 0x191   :  { %v2883_v16 = vpop.f32.mrf.mxu0 }
 0x192   :  { %v648_v17 = vpack.c.bf16 %v628_v14, %v627_v13  ;;  %v575_v20 = vadd.f32 %v2882_v15, %v3743_v4 }
 0x193   :  { %v2884_v18 = vpop.f32.mrf.mxu0 }
 0x194   :  { %v2885_v21 = vadd.f32 %v2884_v18, %v2883_v16  ;;  %903 = vmatmul.mubr.bf16.gmra.mxu1 %v648_v17  ;;  %v629_v26 = vmax.f32 %v575_v20, 0.0 }
 0x195   :  { %v2886_v22 = vpop.f32.mrf.mxu0  ;;  %912 = vmatprep.mubr.bf16.mxu1 %v3648_v55 }
 0x196   :  { %v578_v23 = vadd.f32 %v2885_v21, %v3743_v4 }
 0x197   :  { %v2887_v24 = vpop.f32.mrf.mxu0 }
 0x198   :  { %v630_v27 = vmax.f32 %v578_v23, 0.0  ;;  %v2888_v28 = vadd.f32 %v2887_v24, %v2886_v22 }
 0x199   :  { %v2889_v29 = vpop.f32.mrf.mxu0 }
 0x19a   :  { %v649_v30 = vpack.c.bf16 %v630_v27, %v629_v26  ;;  %v583_v33 = vadd.f32 %v2888_v28, %v3743_v4 }
 0x19b   :  { %v2890_v31 = vpop.f32.mrf.mxu0 }
 0x19c   :  { %v2891_v34 = vadd.f32 %v2890_v31, %v2889_v29  ;;  %913 = vmatmul.mubr.bf16.gmra.mxu1 %v649_v30  ;;  %v631_v39 = vmax.f32 %v583_v33, 0.0  ;;  %v2714_v31 = vld [vmem:[#allocation5] sm:$0xff]   ;;  %v3104_v33 = vld [vmem:[#allocation11 + $0x74] ss:$8 sps:$4 sm:$0xff]  }
 0x19d   :  { %v2892_v35 = vpop.f32.mrf.mxu0  ;;  %922 = vmatprep.mubr.bf16.mxu1 %v3648_v55  ;;  %1579 = vmatprep.subr.bf16.mxu1 %v3104_v33  ;;  %v2715_v38 = vunpack.c.l.bf16 %v2714_v31  ;;  %v3114_v33 = vld [vmem:[#allocation11 + $0x30] ss:$8 sps:$4 sm:$0xff]  }
 0x19e   :  { %v586_v36 = vadd.f32 %v2891_v34, %v3743_v4  ;;  %1580 = vmatpush1.bf16.msra.mxu1 %v3102_v32 }
 0x19f   :  { %v2893_v37 = vpop.f32.mrf.mxu0 }
 0x1a0   :  { %v632_v40 = vmax.f32 %v586_v36, 0.0  ;;  %v2894_v41 = vadd.f32 %v2893_v37, %v2892_v35 }
 0x1a1   :  { %v2895_v42 = vpop.f32.mrf.mxu0 }
 0x1a2   :  { %v650_v43 = vpack.c.bf16 %v632_v40, %v631_v39  ;;  %v591_v45 = vadd.f32 %v2894_v41, %v3743_v4 }
 0x1a3   :  { %v2896_v44 = vpop.f32.mrf.mxu0 }
 0x1a4   :  { %v2897_v46 = vadd.f32 %v2896_v44, %v2895_v42  ;;  %923 = vmatmul.mubr.bf16.gmra.mxu1 %v650_v43  ;;  %v633_v50 = vmax.f32 %v591_v45, 0.0  ;;  %v2716_v45 = vunpack.c.h.bf16 %v2714_v31 }
 0x1a5   :  { %v2898_v47 = vpop.f32.mrf.mxu0  ;;  %932 = vmatprep.mubr.bf16.mxu1 %v3648_v55 }
 0x1a6   :  { %v594_v48 = vadd.f32 %v2897_v46, %v3743_v4 }
 0x1a7   :  { %v2899_v49 = vpop.f32.mrf.mxu0 }
 0x1a8   :  { %v634_v51 = vmax.f32 %v594_v48, 0.0  ;;  %v2900_v52 = vadd.f32 %v2899_v49, %v2898_v47 }
 0x1a9   :  { %v2901_v53 = vpop.f32.mrf.mxu0 }
 0x1aa   :  { %v651_v54 = vpack.c.bf16 %v634_v51, %v633_v50  ;;  %v599_v57 = vadd.f32 %v2900_v52, %v3743_v4  ;;  %v2777_v50 = vld [vmem:[#allocation5 + $0x8] sm:$0xff]  }
 0x1ab   :  { %v2902_v56 = vpop.f32.mrf.mxu0  ;;  %v3105_v51 = vld [vmem:[#allocation11 + $0x60] ss:$8 sps:$4 sm:$0xff]   ;;  %v3107_v52 = vld [vmem:[#allocation11 + $0x64] ss:$8 sps:$4 sm:$0xff]  }
 0x1ac   :  { %v2903_v58 = vadd.f32 %v2902_v56, %v2901_v53  ;;  %933 = vmatmul.mubr.bf16.gmra.mxu1 %v651_v54  ;;  %v635_v60 = vmax.f32 %v599_v57, 0.0  ;;  %v3110_v56 = vld [vmem:[#allocation11 + $0x54] ss:$8 sps:$4 sm:$0xff]   ;;  %1581 = vmatprep.subr.bf16.mxu1 %v3107_v52 }
 0x1ad   :  { %942 = vmatprep.mubr.bf16.mxu1 %v3648_v55  ;;  %1582 = vmatpush1.bf16.msra.mxu1 %v3105_v51 }
 0x1ae   :  { %v602_v59 = vadd.f32 %v2903_v58, %v3743_v4  ;;  %v3801_v4 = vrot.slane %v115_v2, %v672_v1  ;;  %1583 = vmatprep.subr.bf16.mxu1 %v3110_v56 }
 0x1b0   :  { %v636_v61 = vmax.f32 %v602_v59, 0.0 }
 0x1b1   :  { %1584 = vmatpush1.bf16.msra.mxu1 %v3108_v63 }
 0x1b2   :  { %v652_v62 = vpack.c.bf16 %v636_v61, %v635_v60 }
 0x1b4   :  { %943 = vmatmul.mubr.bf16.gmra.mxu1 %v652_v62  ;;  %v2719_v62 = vunpack.c.l.bf16 %v2777_v50 }
 0x1b5   :  { %1611 = vmatprep.mubr.bf16.mxu1 %v3648_v55 }
 0x1fc   :  { %v794_v6 = vpop.f32.mrf.mxu0 }
 0x1fd   :  { %v3808_v7 = vadd.f32 %v794_v6, %v3801_v4 }
 0x1fe   :  { %v796_v8 = vpop.f32.mrf.mxu0 }
 0x1ff   :  { %2380 = vst [vmem:[#allocation14] sm:$0xff] %v3808_v7  ;;  %v797_v9 = vadd.f32 %v796_v8, %v3805_v5 }
 0x200   :  { %v798_v10 = vpop.f32.mrf.mxu0 }
 0x201   :  { %v953_v11 = vmul.f32 0.5, %v797_v9  ;;  %2412 = vst [vmem:[#allocation16] sm:$0xff] %v797_v9  ;;  %v3813_v12 = vadd.f32 %v798_v10, %v3801_v4  ;;  %v3113_v9 = vld [vmem:[#allocation11 + $0x44] ss:$8 sps:$4 sm:$0xff]  }
 0x202   :  { %v800_v13 = vpop.f32.mrf.mxu0  ;;  %1585 = vmatprep.subr.bf16.mxu1 %v3113_v9 }
 0x203   :  { %v985_v14 = vmul.f32 1.442695, %v953_v11  ;;  %2381 = vst [vmem:[#allocation14 + $0x8] sm:$0xff] %v3813_v12  ;;  %v801_v15 = vadd.f32 %v800_v13, %v3805_v5 }
 0x204   :  { %v804_v16 = vpop.f32.mrf.mxu0 }
 0x205   :  { %3126 = vpow2.f32 %v985_v14  ;;  %v954_v17 = vmul.f32 0.5, %v801_v15  ;;  %2413 = vst [vmem:[#allocation16 + $0x8] sm:$0xff] %v801_v15  ;;  %v3818_v18 = vadd.f32 %v804_v16, %v3801_v4  ;;  %v2720_v15 = vunpack.c.h.bf16 %v2777_v50  ;;  %v3122_v50 = vld [vmem:[#allocation11 + $0x14] ss:$8 sps:$4 sm:$0xff]  }
 0x206   :  { %v806_v19 = vpop.f32.mrf.mxu0 }
 0x207   :  { %v987_v20 = vmul.f32 1.442695, %v954_v17  ;;  %2382 = vst [vmem:[#allocation14 + $0x10] sm:$0xff] %v3818_v18  ;;  %v807_v21 = vadd.f32 %v806_v19, %v3805_v5  ;;  %v3111_v19 = vld [vmem:[#allocation11 + $0x40] ss:$8 sps:$4 sm:$0xff]  }
 0x208   :  { %v808_v22 = vpop.f32.mrf.mxu0  ;;  %1586 = vmatpush1.bf16.msra.mxu1 %v3111_v19 }
 0x209   :  { %3128 = vpow2.f32 %v987_v20  ;;  %v955_v23 = vmul.f32 0.5, %v807_v21  ;;  %2414 = vst [vmem:[#allocation16 + $0x10] sm:$0xff] %v807_v21  ;;  %v3823_v24 = vadd.f32 %v808_v22, %v3801_v4  ;;  %v2778_v21 = vld [vmem:[#allocation5 + $0x10] sm:$0xff]  }
 0x20a   :  { %v810_v25 = vpop.f32.mrf.mxu0  ;;  %v3116_v22 = vld [vmem:[#allocation11 + $0x34] ss:$8 sps:$4 sm:$0xff]   ;;  %v2723_v32 = vunpack.c.l.bf16 %v2778_v21 }
 0x20b   :  { %v989_v26 = vmul.f32 1.442695, %v955_v23  ;;  %2383 = vst [vmem:[#allocation14 + $0x18] sm:$0xff] %v3823_v24  ;;  %v811_v27 = vadd.f32 %v810_v25, %v3805_v5  ;;  %1587 = vmatprep.subr.bf16.mxu1 %v3116_v22 }
 0x20c   :  { %v814_v28 = vpop.f32.mrf.mxu0  ;;  %1588 = vmatpush1.bf16.msra.mxu1 %v3114_v33 }
 0x20d   :  { %3130 = vpow2.f32 %v989_v26  ;;  %v956_v29 = vmul.f32 0.5, %v811_v27  ;;  %2415 = vst [vmem:[#allocation16 + $0x18] sm:$0xff] %v811_v27  ;;  %v3828_v30 = vadd.f32 %v814_v28, %v3801_v4 }
 0x20e   :  { %v816_v34 = vpop.f32.mrf.mxu0 }
 0x20f   :  { %v991_v35 = vmul.f32 1.442695, %v956_v29  ;;  %2384 = vst [vmem:[#allocation14 + $0x20] sm:$0xff] %v3828_v30  ;;  %v817_v36 = vadd.f32 %v816_v34, %v3805_v5 }
 0x210   :  { %v818_v37 = vpop.f32.mrf.mxu0 }
 0x211   :  { %3132 = vpow2.f32 %v991_v35  ;;  %v957_v39 = vmul.f32 0.5, %v817_v36  ;;  %2416 = vst [vmem:[#allocation16 + $0x20] sm:$0xff] %v817_v36  ;;  %v3833_v40 = vadd.f32 %v818_v37, %v3801_v4  ;;  %v3119_v37 = vld [vmem:[#allocation11 + $0x24] ss:$8 sps:$4 sm:$0xff]  }
 0x212   :  { %v3127_v41 = vpop.eup %3126  ;;  %v820_v42 = vpop.f32.mrf.mxu0  ;;  %1589 = vmatprep.subr.bf16.mxu1 %v3119_v37 }
 0x213   :  { %v993_v43 = vmul.f32 1.442695, %v957_v39  ;;  %2385 = vst [vmem:[#allocation14 + $0x28] sm:$0xff] %v3833_v40  ;;  %v821_v44 = vadd.f32 %v820_v42, %v3805_v5  ;;  %v1113_v47 = vmul.f32 %v3127_v41, %v2715_v38 }
 0x214   :  { %v824_v46 = vpop.f32.mrf.mxu0 }
 0x215   :  { %3134 = vpow2.f32 %v993_v43  ;;  %v958_v48 = vmul.f32 0.5, %v821_v44  ;;  %2417 = vst [vmem:[#allocation16 + $0x28] sm:$0xff] %v821_v44  ;;  %v3838_v49 = vadd.f32 %v824_v46, %v3801_v4  ;;  %v1145_v61 = vadd.f32 %v1113_v47, %v3808_v7  ;;  %v3117_v46 = vld [vmem:[#allocation11 + $0x20] ss:$8 sps:$4 sm:$0xff]  }
 0x216   :  { %v3129_v53 = vpop.eup %3128  ;;  %v826_v54 = vpop.f32.mrf.mxu0  ;;  %v2724_v43 = vunpack.c.h.bf16 %v2778_v21  ;;  %1590 = vmatpush1.bf16.msra.mxu1 %v3117_v46 }
 0x217   :  { %v995_v57 = vmul.f32 1.442695, %v958_v48  ;;  %2386 = vst [vmem:[#allocation14 + $0x30] sm:$0xff] %v3838_v49  ;;  %v827_v58 = vadd.f32 %v826_v54, %v3805_v5  ;;  %v1114_v59 = vmul.f32 %v3129_v53, %v2716_v45  ;;  %v2779_v48 = vld [vmem:[#allocation5 + $0x18] sm:$0xff]   ;;  %1591 = vmatprep.subr.bf16.mxu1 %v3122_v50 }
 0x218   :  { %v828_v60 = vpop.f32.mrf.mxu0 }
 0x219   :  { %3136 = vpow2.f32 %v995_v57  ;;  %v959_v2 = vmul.f32 0.5, %v827_v58  ;;  %2418 = vst [vmem:[#allocation16 + $0x30] sm:$0xff] %v827_v58  ;;  %v3844_v6 = vadd.f32 %v828_v60, %v3801_v4  ;;  %v1146_v8 = vadd.f32 %v1114_v59, %v3813_v12  ;;  %v3120_v60 = vld [vmem:[#allocation11 + $0x10] ss:$8 sps:$4 sm:$0xff]  }
 0x21a   :  { %v3131_v10 = vpop.eup %3130  ;;  %v830_v11 = vpop.f32.mrf.mxu0  ;;  %v2727_v59 = vunpack.c.l.bf16 %v2779_v48  ;;  %1592 = vmatpush1.bf16.msra.mxu1 %v3120_v60 }
 0x21b   :  { %v997_v13 = vmul.f32 1.442695, %v959_v2  ;;  %2387 = vst [vmem:[#allocation14 + $0x38] sm:$0xff] %v3844_v6  ;;  %v831_v7 = vadd.f32 %v830_v11, %v3805_v5  ;;  %v1177_v14 = vpack.c.bf16 %v1146_v8, %v1145_v61  ;;  %v1115_v17 = vmul.f32 %v3131_v10, %v2719_v62 }
 0x21c   :  { %v834_v16 = vpop.f32.mrf.mxu1  ;;  %v2728_v11 = vunpack.c.h.bf16 %v2779_v48 }
 0x21d   :  { %3138 = vpow2.f32 %v997_v13  ;;  %v960_v20 = vmul.f32 0.5, %v831_v7  ;;  %2419 = vst [vmem:[#allocation16 + $0x38] sm:$0xff] %v831_v7  ;;  %v3850_v12 = vadd.f32 %v834_v16, %v3801_v4  ;;  %2944 = vmatprep.mubr.bf16.mxu0 %v1177_v14  ;;  %v1147_v31 = vadd.f32 %v1115_v17, %v3818_v18 }
 0x21e   :  { %v3133_v23 = vpop.eup %3132  ;;  %v836_v25 = vpop.f32.mrf.mxu1 }
 0x21f   :  { %v999_v26 = vmul.f32 1.442695, %v960_v20  ;;  %2388 = vst [vmem:[#allocation14 + $0x40] sm:$0xff] %v3850_v12  ;;  %v837_v27 = vadd.f32 %v836_v25, %v3805_v5  ;;  %v1116_v28 = vmul.f32 %v3133_v23, %v2720_v15 }
 0x220   :  { %v838_v29 = vpop.f32.mrf.mxu1 }
 0x221   :  { %3140 = vpow2.f32 %v999_v26  ;;  %v961_v34 = vmul.f32 0.5, %v837_v27  ;;  %2420 = vst [vmem:[#allocation16 + $0x40] sm:$0xff] %v837_v27  ;;  %v3856_v35 = vadd.f32 %v838_v29, %v3801_v4  ;;  %v1148_v36 = vadd.f32 %v1116_v28, %v3823_v24 }
 0x222   :  { %v3135_v38 = vpop.eup %3134  ;;  %v840_v39 = vpop.f32.mrf.mxu1 }
 0x223   :  { %v1001_v41 = vmul.f32 1.442695, %v961_v34  ;;  %2389 = vst [vmem:[#allocation14 + $0x48] sm:$0xff] %v3856_v35  ;;  %v841_v18 = vadd.f32 %v840_v39, %v3805_v5  ;;  %v1178_v42 = vpack.c.bf16 %v1148_v36, %v1147_v31  ;;  %v1117_v45 = vmul.f32 %v3135_v38, %v2723_v32 }
 0x224   :  { %v844_v44 = vpop.f32.mrf.mxu1 }
 0x225   :  { %3142 = vpow2.f32 %v1001_v41  ;;  %v962_v47 = vmul.f32 0.5, %v841_v18  ;;  %2421 = vst [vmem:[#allocation16 + $0x48] sm:$0xff] %v841_v18  ;;  %v3862_v24 = vadd.f32 %v844_v44, %v3801_v4  ;;  %2945 = vmatmul.mubr.bf16.vlgmr.msra.gmra.mxu0 %v1178_v42  ;;  %v1149_v58 = vadd.f32 %v1117_v45, %v3828_v30  ;;  %v2781_v41 = vld [vmem:[#allocation5 + $0x28] sm:$0xff]  }
 0x226   :  { %v3137_v51 = vpop.eup %3136  ;;  %v846_v52 = vpop.f32.mrf.mxu1 }
 0x227   :  { %v1003_v53 = vmul.f32 1.442695, %v962_v47  ;;  %2390 = vst [vmem:[#allocation14 + $0x50] sm:$0xff] %v3862_v24  ;;  %v847_v54 = vadd.f32 %v846_v52, %v3805_v5  ;;  %v1118_v56 = vmul.f32 %v3137_v51, %v2724_v43  ;;  %v2735_v47 = vunpack.c.l.bf16 %v2781_v41 }
 0x228   :  { %v848_v57 = vpop.f32.mrf.mxu1 }
 0x229   :  { %3144 = vpow2.f32 %v1003_v53  ;;  %v963_v61 = vmul.f32 0.5, %v847_v54  ;;  %2422 = vst [vmem:[#allocation16 + $0x50] sm:$0xff] %v847_v54  ;;  %v3868_v62 = vadd.f32 %v848_v57, %v3801_v4  ;;  %v1150_v63 = vadd.f32 %v1118_v56, %v3833_v40  ;;  %v2780_v40 = vld [vmem:[#allocation5 + $0x20] sm:$0xff]  }
 0x22a   :  { %v3139_v2 = vpop.eup %3138  ;;  %v850_v8 = vpop.f32.mrf.mxu1  ;;  %v2731_v25 = vunpack.c.l.bf16 %v2780_v40  ;;  %v2732_v36 = vunpack.c.h.bf16 %v2780_v40 }
 0x22b   :  { %v1005_v9 = vmul.f32 1.442695, %v963_v61  ;;  %2391 = vst [vmem:[#allocation14 + $0x58] sm:$0xff] %v3868_v62  ;;  %v851_v10 = vadd.f32 %v850_v8, %v3805_v5  ;;  %v1179_v30 = vpack.c.bf16 %v1150_v63, %v1149_v58  ;;  %v1119_v7 = vmul.f32 %v3139_v2, %v2727_v59  ;;  %v2782_v63 = vld [vmem:[#allocation5 + $0x30] sm:$0xff]  }
 0x22c   :  { %v854_v13 = vpop.f32.mrf.mxu1  ;;  %v2736_v58 = vunpack.c.h.bf16 %v2781_v41 }
 0x22d   :  { %3146 = vpow2.f32 %v1005_v9  ;;  %v964_v14 = vmul.f32 0.5, %v851_v10  ;;  %2423 = vst [vmem:[#allocation16 + $0x58] sm:$0xff] %v851_v10  ;;  %v3874_v15 = vadd.f32 %v854_v13, %v3801_v4  ;;  %2948 = vmatprep.mubr.bf16.mxu0 %v1179_v30  ;;  %v1151_v23 = vadd.f32 %v1119_v7, %v3838_v49 }
 0x22e   :  { %v3141_v16 = vpop.eup %3140  ;;  %v856_v17 = vpop.f32.mrf.mxu1  ;;  %v2739_v13 = vunpack.c.l.bf16 %v2782_v63 }
 0x22f   :  { %v1007_v19 = vmul.f32 1.442695, %v964_v14  ;;  %2392 = vst [vmem:[#allocation14 + $0x60] sm:$0xff] %v3874_v15  ;;  %v857_v20 = vadd.f32 %v856_v17, %v3805_v5  ;;  %v1120_v21 = vmul.f32 %v3141_v16, %v2728_v11 }
 0x230   :  { %v858_v22 = vpop.f32.mrf.mxu1 }
 0x231   :  { %3148 = vpow2.f32 %v1007_v19  ;;  %v965_v26 = vmul.f32 0.5, %v857_v20  ;;  %2424 = vst [vmem:[#allocation16 + $0x60] sm:$0xff] %v857_v20  ;;  %v3880_v27 = vadd.f32 %v858_v22, %v3801_v4  ;;  %v1152_v28 = vadd.f32 %v1120_v21, %v3844_v6 }
 0x232   :  { %v3143_v29 = vpop.eup %3142  ;;  %v860_v31 = vpop.f32.mrf.mxu1  ;;  %v2740_v22 = vunpack.c.h.bf16 %v2782_v63 }
 0x233   :  { %v1009_v32 = vmul.f32 1.442695, %v965_v26  ;;  %2393 = vst [vmem:[#allocation14 + $0x68] sm:$0xff] %v3880_v27  ;;  %v861_v33 = vadd.f32 %v860_v31, %v3805_v5  ;;  %v1180_v34 = vpack.c.bf16 %v1152_v28, %v1151_v23  ;;  %v1121_v49 = vmul.f32 %v3143_v29, %v2731_v25  ;;  %v2783_v28 = vld [vmem:[#allocation5 + $0x38] sm:$0xff]  }
 0x234   :  { %v864_v37 = vpop.f32.mrf.mxu1 }
 0x235   :  { %3150 = vpow2.f32 %v1009_v32  ;;  %v966_v38 = vmul.f32 0.5, %v861_v33  ;;  %2425 = vst [vmem:[#allocation16 + $0x68] sm:$0xff] %v861_v33  ;;  %v3886_v39 = vadd.f32 %v864_v37, %v3801_v4  ;;  %2949 = vmatmul.mubr.bf16.gmra.mxu0 %v1180_v34  ;;  %v1153_v46 = vadd.f32 %v1121_v49, %v3850_v12 }
 0x236   :  { %v3145_v6 = vpop.eup %3144  ;;  %v866_v18 = vpop.f32.mrf.mxu1  ;;  %v2743_v37 = vunpack.c.l.bf16 %v2783_v28 }
 0x237   :  { %v1011_v42 = vmul.f32 1.442695, %v966_v38  ;;  %2394 = vst [vmem:[#allocation14 + $0x70] sm:$0xff] %v3886_v39  ;;  %v867_v43 = vadd.f32 %v866_v18, %v3805_v5  ;;  %v1122_v44 = vmul.f32 %v3145_v6, %v2732_v36 }
 0x238   :  { %v868_v45 = vpop.f32.mrf.mxu1 }
 0x239   :  { %3152 = vpow2.f32 %v1011_v42  ;;  %v967_v48 = vmul.f32 0.5, %v867_v43  ;;  %2426 = vst [vmem:[#allocation16 + $0x70] sm:$0xff] %v867_v43  ;;  %v3892_v50 = vadd.f32 %v868_v45, %v3801_v4  ;;  %v1154_v51 = vadd.f32 %v1122_v44, %v3856_v35 }
 0x23a   :  { %v3147_v52 = vpop.eup %3146  ;;  %v870_v53 = vpop.f32.mrf.mxu1  ;;  %v2744_v45 = vunpack.c.h.bf16 %v2783_v28 }
 0x23b   :  { %v1013_v54 = vmul.f32 1.442695, %v967_v48  ;;  %2395 = vst [vmem:[#allocation14 + $0x78] sm:$0xff] %v3892_v50  ;;  %v871_v56 = vadd.f32 %v870_v53, %v3805_v5  ;;  %v1181_v57 = vpack.c.bf16 %v1154_v51, %v1153_v46  ;;  %v1123_v12 = vmul.f32 %v3147_v52, %v2735_v47  ;;  %v2784_v51 = vld [vmem:[#allocation5 + $0x40] sm:$0xff]  }
 0x23c   :  { %v874_v59 = vpop.f32.mrf.mxu1 }
 0x23d   :  { %3154 = vpow2.f32 %v1013_v54  ;;  %v968_v60 = vmul.f32 0.5, %v871_v56  ;;  %2427 = vst [vmem:[#allocation16 + $0x78] sm:$0xff] %v871_v56  ;;  %v3898_v61 = vadd.f32 %v874_v59, %v3801_v4  ;;  %2952 = vmatprep.mubr.bf16.mxu0 %v1181_v57  ;;  %v1155_v11 = vadd.f32 %v1123_v12, %v3862_v24 }
 0x23e   :  { %v3149_v35 = vpop.eup %3148  ;;  %v876_v2 = vpop.f32.mrf.mxu1  ;;  %v2747_v59 = vunpack.c.l.bf16 %v2784_v51 }
 0x23f   :  { %v1015_v8 = vmul.f32 1.442695, %v968_v60  ;;  %2396 = vst [vmem:[#allocation14 + $0x80] sm:$0xff] %v3898_v61  ;;  %v877_v9 = vadd.f32 %v876_v2, %v3805_v5  ;;  %v1124_v10 = vmul.f32 %v3149_v35, %v2736_v58 }
 0x240   :  { %v878_v30 = vpop.f32.mrf.mxu1 }
 0x241   :  { %3156 = vpow2.f32 %v1015_v8  ;;  %v969_v7 = vmul.f32 0.5, %v877_v9  ;;  %2428 = vst [vmem:[#allocation16 + $0x80] sm:$0xff] %v877_v9  ;;  %v3904_v14 = vadd.f32 %v878_v30, %v3801_v4  ;;  %v1156_v40 = vadd.f32 %v1124_v10, %v3868_v62 }
 0x242   :  { %v3151_v16 = vpop.eup %3150  ;;  %v880_v17 = vpop.f32.mrf.mxu1  ;;  %v2748_v30 = vunpack.c.h.bf16 %v2784_v51 }
 0x243   :  { %v1017_v19 = vmul.f32 1.442695, %v969_v7  ;;  %2397 = vst [vmem:[#allocation14 + $0x88] sm:$0xff] %v3904_v14  ;;  %v881_v20 = vadd.f32 %v880_v17, %v3805_v5  ;;  %v1182_v21 = vpack.c.bf16 %v1156_v40, %v1155_v11  ;;  %v1125_v24 = vmul.f32 %v3151_v16, %v2739_v13  ;;  %v2785_v40 = vld [vmem:[#allocation5 + $0x48] sm:$0xff]  }
 0x244   :  { %v884_v23 = vpop.f32.mrf.mxu1 }
 0x245   :  { %3158 = vpow2.f32 %v1017_v19  ;;  %v970_v25 = vmul.f32 0.5, %v881_v20  ;;  %2429 = vst [vmem:[#allocation16 + $0x88] sm:$0xff] %v881_v20  ;;  %v3910_v26 = vadd.f32 %v884_v23, %v3801_v4  ;;  %2953 = vmatmul.mubr.bf16.gmra.mxu0 %v1182_v21  ;;  %v1157_v36 = vadd.f32 %v1125_v24, %v3874_v15 }
 0x246   :  { %v3153_v62 = vpop.eup %3152  ;;  %v886_v29 = vpop.f32.mrf.mxu1  ;;  %v2751_v23 = vunpack.c.l.bf16 %v2785_v40 }
 0x247   :  { %v1019_v31 = vmul.f32 1.442695, %v970_v25  ;;  %2398 = vst [vmem:[#allocation14 + $0x90] sm:$0xff] %v3910_v26  ;;  %v887_v32 = vadd.f32 %v886_v29, %v3805_v5  ;;  %v1126_v33 = vmul.f32 %v3153_v62, %v2740_v22 }
 0x248   :  { %v888_v34 = vpop.f32.mrf.mxu1 }
 0x249   :  { %3160 = vpow2.f32 %v1019_v31  ;;  %v971_v49 = vmul.f32 0.5, %v887_v32  ;;  %2430 = vst [vmem:[#allocation16 + $0x90] sm:$0xff] %v887_v32  ;;  %v3916_v38 = vadd.f32 %v888_v34, %v3801_v4  ;;  %v1158_v41 = vadd.f32 %v1126_v33, %v3880_v27 }
 0x24a   :  { %v3155_v6 = vpop.eup %3154  ;;  %v890_v18 = vpop.f32.mrf.mxu1  ;;  %v2752_v34 = vunpack.c.h.bf16 %v2785_v40 }
 0x24b   :  { %v1021_v42 = vmul.f32 1.442695, %v971_v49  ;;  %2399 = vst [vmem:[#allocation14 + $0x98] sm:$0xff] %v3916_v38  ;;  %v891_v43 = vadd.f32 %v890_v18, %v3805_v5  ;;  %v1183_v44 = vpack.c.bf16 %v1158_v41, %v1157_v36  ;;  %v1127_v15 = vmul.f32 %v3155_v6, %v2743_v37  ;;  %v2786_v41 = vld [vmem:[#allocation5 + $0x50] sm:$0xff]  }
 0x24c   :  { %v894_v46 = vpop.f32.mrf.mxu1 }
 0x24d   :  { %3162 = vpow2.f32 %v1021_v42  ;;  %v972_v47 = vmul.f32 0.5, %v891_v43  ;;  %2431 = vst [vmem:[#allocation16 + $0x98] sm:$0xff] %v891_v43  ;;  %v3922_v48 = vadd.f32 %v894_v46, %v3801_v4  ;;  %2956 = vmatprep.mubr.bf16.mxu0 %v1183_v44  ;;  %v1159_v58 = vadd.f32 %v1127_v15, %v3886_v39 }
 0x24e   :  { %v3157_v27 = vpop.eup %3156  ;;  %v896_v52 = vpop.f32.mrf.mxu1  ;;  %v2755_v46 = vunpack.c.l.bf16 %v2786_v41 }
 0x24f   :  { %v1023_v53 = vmul.f32 1.442695, %v972_v47  ;;  %2400 = vst [vmem:[#allocation14 + $0xa0] sm:$0xff] %v3922_v48  ;;  %v897_v54 = vadd.f32 %v896_v52, %v3805_v5  ;;  %v1128_v56 = vmul.f32 %v3157_v27, %v2744_v45 }
 0x250   :  { %v898_v57 = vpop.f32.mrf.mxu1 }
 0x251   :  { %3164 = vpow2.f32 %v1023_v53  ;;  %v973_v12 = vmul.f32 0.5, %v897_v54  ;;  %2432 = vst [vmem:[#allocation16 + $0xa0] sm:$0xff] %v897_v54  ;;  %v3928_v60 = vadd.f32 %v898_v57, %v3801_v4  ;;  %v1160_v63 = vadd.f32 %v1128_v56, %v3892_v50 }
 0x252   :  { %v3159_v35 = vpop.eup %3158  ;;  %v900_v2 = vpop.f32.mrf.mxu1  ;;  %v2756_v57 = vunpack.c.h.bf16 %v2786_v41 }
 0x253   :  { %v1025_v8 = vmul.f32 1.442695, %v973_v12  ;;  %2401 = vst [vmem:[#allocation14 + $0xa8] sm:$0xff] %v3928_v60  ;;  %v901_v9 = vadd.f32 %v900_v2, %v3805_v5  ;;  %v1184_v10 = vpack.c.bf16 %v1160_v63, %v1159_v58  ;;  %v1129_v39 = vmul.f32 %v3159_v35, %v2747_v59  ;;  %v2787_v63 = vld [vmem:[#allocation5 + $0x58] sm:$0xff]  }
 0x254   :  { %v904_v11 = vpop.f32.mrf.mxu1 }
 0x255   :  { %3166 = vpow2.f32 %v1025_v8  ;;  %v974_v13 = vmul.f32 0.5, %v901_v9  ;;  %2433 = vst [vmem:[#allocation16 + $0xa8] sm:$0xff] %v901_v9  ;;  %v3934_v7 = vadd.f32 %v904_v11, %v3801_v4  ;;  %2957 = vmatmul.mubr.bf16.gmra.mxu0 %v1184_v10  ;;  %v1161_v22 = vadd.f32 %v1129_v39, %v3898_v61  ;;  %v3123_v39 = vld [vmem:[#allocation11] ss:$8 sps:$4 sm:$0xff]  }
 0x256   :  { %v3161_v50 = vpop.eup %3160  ;;  %v906_v16 = vpop.f32.mrf.mxu1  ;;  %v2759_v11 = vunpack.c.l.bf16 %v2787_v63 }
 0x257   :  { %v1027_v17 = vmul.f32 1.442695, %v974_v13  ;;  %2402 = vst [vmem:[#allocation14 + $0xb0] sm:$0xff] %v3934_v7  ;;  %v907_v19 = vadd.f32 %v906_v16, %v3805_v5  ;;  %v1130_v20 = vmul.f32 %v3161_v50, %v2748_v30  ;;  %v3125_v13 = vld [vmem:[#allocation11 + $0x4] ss:$8 sps:$4 sm:$0xff]  }
 0x258   :  { %v908_v21 = vpop.f32.mrf.mxu1  ;;  %1593 = vmatprep.subr.bf16.mxu1 %v3125_v13 }
 0x259   :  { %3168 = vpow2.f32 %v1027_v17  ;;  %v975_v24 = vmul.f32 0.5, %v907_v19  ;;  %2434 = vst [vmem:[#allocation16 + $0xb0] sm:$0xff] %v907_v19  ;;  %v3940_v25 = vadd.f32 %v908_v21, %v3801_v4  ;;  %v1162_v28 = vadd.f32 %v1130_v20, %v3904_v14  ;;  %1594 = vmatpush1.bf16.msra.mxu1 %v3123_v39 }
 0x25a   :  { %v3163_v62 = vpop.eup %3162  ;;  %v910_v29 = vpop.f32.mrf.mxu1 }
 0x25b   :  { %v1029_v31 = vmul.f32 1.442695, %v975_v24  ;;  %2403 = vst [vmem:[#allocation14 + $0xb8] sm:$0xff] %v3940_v25  ;;  %v911_v32 = vadd.f32 %v910_v29, %v3805_v5  ;;  %v1185_v33 = vpack.c.bf16 %v1162_v28, %v1161_v22  ;;  %v1131_v61 = vmul.f32 %v3163_v62, %v2751_v23 }
 0x25c   :  { %v914_v36 = vpop.f32.mrf.mxu1  ;;  %v2760_v22 = vunpack.c.h.bf16 %v2787_v63 }
 0x25d   :  { %3170 = vpow2.f32 %v1029_v31  ;;  %v976_v37 = vmul.f32 0.5, %v911_v32  ;;  %2435 = vst [vmem:[#allocation16 + $0xb8] sm:$0xff] %v911_v32  ;;  %v3946_v49 = vadd.f32 %v914_v36, %v3801_v4  ;;  %2960 = vmatprep.mubr.bf16.mxu0 %v1185_v33  ;;  %v1163_v45 = vadd.f32 %v1131_v61, %v3910_v26 }
 0x25e   :  { %v3165_v14 = vpop.eup %3164  ;;  %v916_v6 = vpop.f32.mrf.mxu1 }
 0x25f   :  { %v1031_v18 = vmul.f32 1.442695, %v976_v37  ;;  %2404 = vst [vmem:[#allocation14 + $0xc0] sm:$0xff] %v3946_v49  ;;  %v917_v42 = vadd.f32 %v916_v6, %v3805_v5  ;;  %v1132_v43 = vmul.f32 %v3165_v14, %v2752_v34 }
 0x260   :  { %v918_v44 = vpop.f32.mrf.mxu1 }
 0x261   :  { %3172 = vpow2.f32 %v1031_v18  ;;  %v977_v15 = vmul.f32 0.5, %v917_v42  ;;  %2436 = vst [vmem:[#allocation16 + $0xc0] sm:$0xff] %v917_v42  ;;  %v3952_v47 = vadd.f32 %v918_v44, %v3801_v4  ;;  %v1164_v51 = vadd.f32 %v1132_v43, %v3916_v38 }
 0x262   :  { %v3167_v27 = vpop.eup %3166  ;;  %v920_v52 = vpop.f32.mrf.mxu1 }
 0x263   :  { %v1033_v53 = vmul.f32 1.442695, %v977_v15  ;;  %2405 = vst [vmem:[#allocation14 + $0xc8] sm:$0xff] %v3952_v47  ;;  %v921_v54 = vadd.f32 %v920_v52, %v3805_v5  ;;  %v1186_v56 = vpack.c.bf16 %v1164_v51, %v1163_v45  ;;  %v1133_v26 = vmul.f32 %v3167_v27, %v2755_v46  ;;  %v2789_v52 = vld [vmem:[#allocation5 + $0x68] sm:$0xff]  }
 0x264   :  { %v924_v58 = vpop.f32.mrf.mxu1 }
 0x265   :  { %3174 = vpow2.f32 %v1033_v53  ;;  %v978_v59 = vmul.f32 0.5, %v921_v54  ;;  %2437 = vst [vmem:[#allocation16 + $0xc8] sm:$0xff] %v921_v54  ;;  %v3958_v12 = vadd.f32 %v924_v58, %v3801_v4  ;;  %2961 = vmatmul.mubr.bf16.gmra.mxu0 %v1186_v56  ;;  %v1165_v30 = vadd.f32 %v1133_v26, %v3922_v48 }
 0x266   :  { %v3169_v38 = vpop.eup %3168  ;;  %v926_v35 = vpop.f32.mrf.mxu1 }
 0x267   :  { %v1035_v2 = vmul.f32 1.442695, %v978_v59  ;;  %2406 = vst [vmem:[#allocation14 + $0xd0] sm:$0xff] %v3958_v12  ;;  %v927_v8 = vadd.f32 %v926_v35, %v3805_v5  ;;  %v1134_v9 = vmul.f32 %v3169_v38, %v2756_v57  ;;  %v2767_v59 = vunpack.c.l.bf16 %v2789_v52 }
 0x268   :  { %v928_v10 = vpop.f32.mrf.mxu1 }
 0x269   :  { %3176 = vpow2.f32 %v1035_v2  ;;  %v979_v40 = vmul.f32 0.5, %v927_v8  ;;  %2438 = vst [vmem:[#allocation16 + $0xd0] sm:$0xff] %v927_v8  ;;  %v3964_v50 = vadd.f32 %v928_v10, %v3801_v4  ;;  %v1166_v16 = vadd.f32 %v1134_v9, %v3928_v60  ;;  %v2788_v60 = vld [vmem:[#allocation5 + $0x60] sm:$0xff]  }
 0x26a   :  { %v3171_v17 = vpop.eup %3170  ;;  %v930_v19 = vpop.f32.mrf.mxu1  ;;  %v2763_v37 = vunpack.c.l.bf16 %v2788_v60  ;;  %v2764_v46 = vunpack.c.h.bf16 %v2788_v60 }
 0x26b   :  { %v1037_v20 = vmul.f32 1.442695, %v979_v40  ;;  %2407 = vst [vmem:[#allocation14 + $0xd8] sm:$0xff] %v3964_v50  ;;  %v931_v21 = vadd.f32 %v930_v19, %v3805_v5  ;;  %v1187_v48 = vpack.c.bf16 %v1166_v16, %v1165_v30  ;;  %v1135_v24 = vmul.f32 %v3171_v17, %v2759_v11  ;;  %v2790_v40 = vld [vmem:[#allocation5 + $0x70] sm:$0xff]  }
 0x26c   :  { %v934_v23 = vpop.f32.mrf.mxu1  ;;  %v2768_v11 = vunpack.c.h.bf16 %v2789_v52  ;;  %v2771_v19 = vunpack.c.l.bf16 %v2790_v40 }
 0x26d   :  { %3178 = vpow2.f32 %v1037_v20  ;;  %v980_v28 = vmul.f32 0.5, %v931_v21  ;;  %2439 = vst [vmem:[#allocation16 + $0xd8] sm:$0xff] %v931_v21  ;;  %v3970_v62 = vadd.f32 %v934_v23, %v3801_v4  ;;  %2964 = vmatprep.mubr.bf16.mxu0 %v1187_v48  ;;  %v1167_v61 = vadd.f32 %v1135_v24, %v3934_v7  ;;  %v2791_v23 = vld [vmem:[#allocation5 + $0x78] sm:$0xff]  }
 0x26e   :  { %v3173_v29 = vpop.eup %3172  ;;  %v936_v31 = vpop.f32.mrf.mxu1 }
 0x26f   :  { %v1039_v32 = vmul.f32 1.442695, %v980_v28  ;;  %2408 = vst [vmem:[#allocation14 + $0xe0] sm:$0xff] %v3970_v62  ;;  %v937_v33 = vadd.f32 %v936_v31, %v3805_v5  ;;  %v1136_v34 = vmul.f32 %v3173_v29, %v2760_v22  ;;  %v2775_v29 = vunpack.c.l.bf16 %v2791_v23 }
 0x270   :  { %v938_v36 = vpop.f32.mrf.mxu1 }
 0x271   :  { %3180 = vpow2.f32 %v1039_v32  ;;  %v981_v41 = vmul.f32 0.5, %v937_v33  ;;  %2440 = vst [vmem:[#allocation16 + $0xe0] sm:$0xff] %v937_v33  ;;  %v939_v14 = vadd.f32 %v938_v36, %v3801_v4  ;;  %v1168_v6 = vadd.f32 %v1136_v34, %v3940_v25 }
 0x272   :  { %v3175_v18 = vpop.eup %3174  ;;  %v940_v42 = vpop.f32.mrf.mxu1  ;;  %v2776_v33 = vunpack.c.h.bf16 %v2791_v23 }
 0x273   :  { %v1041_v43 = vmul.f32 1.442695, %v981_v41  ;;  %2409 = vst [vmem:[#allocation14 + $0xe8] sm:$0xff] %v939_v14  ;;  %v941_v44 = vadd.f32 %v940_v42, %v3805_v5  ;;  %v1188_v45 = vpack.c.bf16 %v1168_v6, %v1167_v61  ;;  %v1137_v51 = vmul.f32 %v3175_v18, %v2763_v37  ;;  %v3990_v18 = vld [vmem:[%s4138_s6 + $0x3] ss:$0 sm:$0xff] }
 0x274   :  { %v944_v15 = vpop.f32.mrf.mxu1 }
 0x275   :  { %3182 = vpow2.f32 %v1041_v43  ;;  %v982_v7 = vmul.f32 0.5, %v941_v44  ;;  %2441 = vst [vmem:[#allocation16 + $0xe8] sm:$0xff] %v941_v44  ;;  %v945_v27 = vadd.f32 %v944_v15, %v3801_v4  ;;  %2965 = vmatmul.mubr.bf16.gmra.mxu0 %v1188_v45  ;;  %v1169_v26 = vadd.f32 %v1137_v51, %v3946_v49 }
 0x276   :  { %v3177_v53 = vpop.eup %3176  ;;  %v946_v54 = vpop.f32.mrf.mxu1 }
 0x277   :  { %v1043_v25 = vmul.f32 1.442695, %v982_v7  ;;  %2410 = vst [vmem:[#allocation14 + $0xf0] sm:$0xff] %v945_v27  ;;  %v947_v56 = vadd.f32 %v946_v54, %v3805_v5  ;;  %v1138_v57 = vmul.f32 %v3177_v53, %v2764_v46 }
 0x278   :  { %v948_v58 = vpop.f32.mrf.mxu1 }
 0x279   :  { %3184 = vpow2.f32 %v1043_v25  ;;  %v983_v63 = vmul.f32 0.5, %v947_v56  ;;  %2442 = vst [vmem:[#allocation16 + $0xf0] sm:$0xff] %v947_v56  ;;  %v949_v38 = vadd.f32 %v948_v58, %v3801_v4  ;;  %v1170_v35 = vadd.f32 %v1138_v57, %v3952_v47 }
 0x27a   :  { %v3179_v2 = vpop.eup %3178  ;;  %v950_v8 = vpop.f32.mrf.mxu1 }
 0x27b   :  { %v1045_v9 = vmul.f32 1.442695, %v983_v63  ;;  %2411 = vst [vmem:[#allocation14 + $0xf8] sm:$0xff] %v949_v38  ;;  %v951_v10 = vadd.f32 %v950_v8, %v3805_v5  ;;  %v1189_v30 = vpack.c.bf16 %v1170_v35, %v1169_v26  ;;  %v1139_v49 = vmul.f32 %v3179_v2, %v2767_v59 }
 0x27c   :  { %v2772_v5 = vunpack.c.h.bf16 %v2790_v40 }
 0x27d   :  { %3186 = vpow2.f32 %v1045_v9  ;;  %v984_v39 = vmul.f32 0.5, %v951_v10  ;;  %2443 = vst [vmem:[#allocation16 + $0xf8] sm:$0xff] %v951_v10  ;;  %2968 = vmatprep.mubr.bf16.mxu0 %v1189_v30  ;;  %v1171_v4 = vadd.f32 %v1139_v49, %v3958_v12 }
 0x27e   :  { %v3181_v13 = vpop.eup %3180 }
 0x27f   :  { %v1047_v16 = vmul.f32 1.442695, %v984_v39  ;;  %v1140_v17 = vmul.f32 %v3181_v13, %v2768_v11 }
 0x281   :  { %3188 = vpow2.f32 %v1047_v16  ;;  %v1172_v47 = vadd.f32 %v1140_v17, %v3964_v50 }
 0x282   :  { %v3183_v20 = vpop.eup %3182 }
 0x283   :  { %v1190_v21 = vpack.c.bf16 %v1172_v47, %v1171_v4  ;;  %v1141_v48 = vmul.f32 %v3183_v20, %v2771_v19 }
 0x285   :  { %2969 = vmatmul.mubr.bf16.gmra.mxu0 %v1190_v21  ;;  %v1173_v28 = vadd.f32 %v1141_v48, %v3970_v62 }
 0x286   :  { %v3185_v22 = vpop.eup %3184 }
 0x287   :  { %v1142_v24 = vmul.f32 %v3185_v22, %v2772_v5 }
 0x289   :  { %v1174_v60 = vadd.f32 %v1142_v24, %v939_v14 }
 0x28a   :  { %v3187_v31 = vpop.eup %3186 }
 0x28b   :  { %v1191_v32 = vpack.c.bf16 %v1174_v60, %v1173_v28  ;;  %v1143_v12 = vmul.f32 %v3187_v31, %v2775_v29 }
 0x28d   :  { %2972 = vmatprep.mubr.bf16.mxu0 %v1191_v32  ;;  %v1175_v36 = vadd.f32 %v1143_v12, %v945_v27 }
 0x28e   :  { %v3189_v34 = vpop.eup %3188 }
 0x28f   :  { %v1144_v50 = vmul.f32 %v3189_v34, %v2776_v33 }
 0x291   :  { %v1176_v61 = vadd.f32 %v1144_v50, %v949_v38 }
 0x293   :  { %v1192_v37 = vpack.c.bf16 %v1176_v61, %v1175_v36 }
 0x295   :  { %2973 = vmatmul.mubr.bf16.gmra.mxu0 %v1192_v37 }
 0x2e5   :  { %v2946_v41 = vpop.f32.mrf.mxu0 }
 0x2e6   :  { %v1306_v51 = vadd.f32 %v2946_v41, %v3990_v18 }
 0x2e7   :  { %v1297_v6 = vpop.f32.mrf.mxu0 }
 0x2e8   :  { %v1298_v14 = vadd.f32 %v3990_v18, %v1297_v6  ;;  %v1426_v52 = vmax.f32 %v1306_v51, 0.0 }
 0x2e9   :  { %v2947_v62 = vpop.f32.mrf.mxu0 }
 0x2ea   :  { %v1424_v44 = vmax.f32 %v1298_v14, 0.0  ;;  %v1309_v46 = vadd.f32 %v2947_v62, %v3990_v18 }
 0x2eb   :  { %v1300_v42 = vpop.f32.mrf.mxu0 }
 0x2ec   :  { %v1301_v43 = vadd.f32 %v3990_v18, %v1300_v42  ;;  %v1427_v7 = vmax.f32 %v1309_v46, 0.0 }
 0x2ee   :  { %v1425_v45 = vmax.f32 %v1301_v43, 0.0  ;;  %v1457_v54 = vpack.c.bf16 %v1427_v7, %v1426_v52 }
 0x2f0   :  { %v1456_v15 = vpack.c.bf16 %v1425_v45, %v1424_v44 }
 0x2f2   :  { %1612 = vmatmul.mubr.bf16.vlgmr.msra.gmra.mxu1 %v1456_v15 }
 0x2f3   :  { %1621 = vmatprep.mubr.bf16.mxu1 %v3648_v55 }
 0x2f5   :  { %v2950_v27 = vpop.f32.mrf.mxu0 }
 0x2f6   :  { %v1322_v35 = vadd.f32 %v2950_v27, %v3990_v18 }
 0x2f7   :  { %v1313_v53 = vpop.f32.mrf.mxu0 }
 0x2f8   :  { %v1314_v56 = vadd.f32 %v3990_v18, %v1313_v53  ;;  %v1430_v9 = vmax.f32 %v1322_v35, 0.0 }
 0x2f9   :  { %v2951_v25 = vpop.f32.mrf.mxu0 }
 0x2fa   :  { %1622 = vmatmul.mubr.bf16.gmra.mxu1 %v1457_v54  ;;  %v1428_v26 = vmax.f32 %v1314_v56, 0.0  ;;  %v1325_v63 = vadd.f32 %v2951_v25, %v3990_v18 }
 0x2fb   :  { %v1316_v57 = vpop.f32.mrf.mxu0  ;;  %1631 = vmatprep.mubr.bf16.mxu1 %v3648_v55 }
 0x2fc   :  { %v1317_v58 = vadd.f32 %v3990_v18, %v1316_v57  ;;  %v1431_v2 = vmax.f32 %v1325_v63, 0.0 }
 0x2fe   :  { %v1429_v59 = vmax.f32 %v1317_v58, 0.0  ;;  %v1459_v30 = vpack.c.bf16 %v1431_v2, %v1430_v9 }
 0x300   :  { %v1458_v38 = vpack.c.bf16 %v1429_v59, %v1428_v26 }
 0x302   :  { %1632 = vmatmul.mubr.bf16.gmra.mxu1 %v1458_v38 }
 0x303   :  { %1641 = vmatprep.mubr.bf16.mxu1 %v3648_v55 }
 0x305   :  { %v2954_v8 = vpop.f32.mrf.mxu0 }
 0x306   :  { %v1338_v47 = vadd.f32 %v2954_v8, %v3990_v18 }
 0x307   :  { %v1329_v10 = vpop.f32.mrf.mxu0 }
 0x308   :  { %v1330_v39 = vadd.f32 %v3990_v18, %v1329_v10  ;;  %v1434_v21 = vmax.f32 %v1338_v47, 0.0 }
 0x309   :  { %v2955_v11 = vpop.f32.mrf.mxu0 }
 0x30a   :  { %1642 = vmatmul.mubr.bf16.gmra.mxu1 %v1459_v30  ;;  %v1432_v40 = vmax.f32 %v1330_v39, 0.0  ;;  %v1341_v17 = vadd.f32 %v2955_v11, %v3990_v18 }
 0x30b   :  { %v1332_v49 = vpop.f32.mrf.mxu0  ;;  %1651 = vmatprep.mubr.bf16.mxu1 %v3648_v55 }
 0x30c   :  { %v1333_v13 = vadd.f32 %v3990_v18, %v1332_v49  ;;  %v1435_v19 = vmax.f32 %v1341_v17, 0.0 }
 0x30e   :  { %v1433_v16 = vmax.f32 %v1333_v13, 0.0  ;;  %v1461_v48 = vpack.c.bf16 %v1435_v19, %v1434_v21 }
 0x310   :  { %v1460_v4 = vpack.c.bf16 %v1433_v16, %v1432_v40 }
 0x312   :  { %1652 = vmatmul.mubr.bf16.gmra.mxu1 %v1460_v4 }
 0x313   :  { %1661 = vmatprep.mubr.bf16.mxu1 %v3648_v55 }
 0x315   :  { %v2958_v20 = vpop.f32.mrf.mxu0 }
 0x316   :  { %v1354_v33 = vadd.f32 %v2958_v20, %v3990_v18 }
 0x317   :  { %v1345_v5 = vpop.f32.mrf.mxu0 }
 0x318   :  { %v1346_v23 = vadd.f32 %v3990_v18, %v1345_v5  ;;  %v1438_v50 = vmax.f32 %v1354_v33, 0.0 }
 0x319   :  { %v2959_v22 = vpop.f32.mrf.mxu0 }
 0x31a   :  { %1662 = vmatmul.mubr.bf16.gmra.mxu1 %v1461_v48  ;;  %v1436_v60 = vmax.f32 %v1346_v23, 0.0  ;;  %v1357_v31 = vadd.f32 %v2959_v22, %v3990_v18 }
 0x31b   :  { %v1348_v24 = vpop.f32.mrf.mxu0  ;;  %1671 = vmatprep.mubr.bf16.mxu1 %v3648_v55 }
 0x31c   :  { %v1349_v28 = vadd.f32 %v3990_v18, %v1348_v24  ;;  %v1439_v12 = vmax.f32 %v1357_v31, 0.0 }
 0x31e   :  { %v1437_v29 = vmax.f32 %v1349_v28, 0.0  ;;  %v1463_v61 = vpack.c.bf16 %v1439_v12, %v1438_v50  ;;  %v117_v12 = vld [vmem:[%s4138_s6 + $0x4] sm:$0x3]  ;;  %s3649_s6 = smov [#allocation14]  }
 0x31f   :  { %v4048_v50 = vrot.slane %v117_v12, %v676_v3  ;;  %s2461_s25 = sshll.u32 %s3649_s6, 4  ;;  %s2462_s25 = int_to_ptr.vmem [resolvable:$true] %s2461_s25 }
 0x320   :  { %v1462_v32 = vpack.c.bf16 %v1437_v29, %v1436_v60  ;;  %s3566_s26 = scalar_lea.vmem %s2462_s25, 4096  ;;  %p3571_p3 = scmp.lt.s32.totalorder %s2462_s25, %s2462_s25 }
 0x321   :  { %p3567_p2 = scmp.ne.s32.totalorder %s2462_s25, %s3566_s26  ;;  %p3572_p4 = scmp.lt.s32.totalorder %s3566_s26, %s3566_s26 }
 0x322   :  { %1672 = vmatmul.mubr.bf16.gmra.mxu1 %v1462_v32 }
 0x323   :  { %1681 = vmatprep.mubr.bf16.mxu1 %v3648_v55  ;;  %p3573_p5 = por %p3572_p4, %p3571_p3 }
 0x325   :  { %v2962_v34 = vpop.f32.mrf.mxu0  ;;  %p3574_p6 = pnand %p3573_p5, %p3567_p2 }
 0x326   :  { %v1370_v45 = vadd.f32 %v2962_v34, %v3990_v18  ;;  %v4044_v34 = vrot.slane %v117_v12, %v672_v1 }
 0x327   :  { %v1361_v36 = vpop.f32.mrf.mxu0 }
 0x328   :  { %v1362_v41 = vadd.f32 %v3990_v18, %v1361_v36  ;;  %v1442_v51 = vmax.f32 %v1370_v45, 0.0 }
 0x329   :  { %v2963_v37 = vpop.f32.mrf.mxu0 }
 0x32a   :  { %1682 = vmatmul.mubr.bf16.gmra.mxu1 %v1463_v61  ;;  %v1440_v14 = vmax.f32 %v1362_v41, 0.0  ;;  %v1373_v43 = vadd.f32 %v2963_v37, %v3990_v18 }
 0x32b   :  { %v1364_v6 = vpop.f32.mrf.mxu0  ;;  %1691 = vmatprep.mubr.bf16.mxu1 %v3648_v55 }
 0x32c   :  { %v1365_v62 = vadd.f32 %v3990_v18, %v1364_v6  ;;  %v1443_v46 = vmax.f32 %v1373_v43, 0.0 }
 0x32e   :  { %v1441_v42 = vmax.f32 %v1365_v62, 0.0  ;;  %v1465_v27 = vpack.c.bf16 %v1443_v46, %v1442_v51 }
 0x330   :  { %v1464_v44 = vpack.c.bf16 %v1441_v42, %v1440_v14 }
 0x332   :  { %1692 = vmatmul.mubr.bf16.gmra.mxu1 %v1464_v44 }
 0x333   :  { %1701 = vmatprep.mubr.bf16.mxu1 %v3648_v55 }
 0x335   :  { %v2966_v15 = vpop.f32.mrf.mxu0 }
 0x336   :  { %v1386_v59 = vadd.f32 %v2966_v15, %v3990_v18 }
 0x337   :  { %v1377_v7 = vpop.f32.mrf.mxu0 }
 0x338   :  { %v1378_v53 = vadd.f32 %v3990_v18, %v1377_v7  ;;  %v1446_v35 = vmax.f32 %v1386_v59, 0.0 }
 0x339   :  { %v2967_v52 = vpop.f32.mrf.mxu0 }
 0x33a   :  { %1702 = vmatmul.mubr.bf16.gmra.mxu1 %v1465_v27  ;;  %v1444_v56 = vmax.f32 %v1378_v53, 0.0  ;;  %v1389_v58 = vadd.f32 %v2967_v52, %v3990_v18 }
 0x33b   :  { %v1380_v54 = vpop.f32.mrf.mxu0  ;;  %1711 = vmatprep.mubr.bf16.mxu1 %v3648_v55 }
 0x33c   :  { %v1381_v25 = vadd.f32 %v3990_v18, %v1380_v54  ;;  %v1447_v63 = vmax.f32 %v1389_v58, 0.0 }
 0x33e   :  { %v1445_v57 = vmax.f32 %v1381_v25, 0.0  ;;  %v1467_v8 = vpack.c.bf16 %v1447_v63, %v1446_v35 }
 0x340   :  { %v1466_v26 = vpack.c.bf16 %v1445_v57, %v1444_v56 }
 0x342   :  { %1712 = vmatmul.mubr.bf16.gmra.mxu1 %v1466_v26 }
 0x343   :  { %1721 = vmatprep.mubr.bf16.mxu1 %v3648_v55 }
 0x345   :  { %v2970_v38 = vpop.f32.mrf.mxu0 }
 0x346   :  { %v1402_v16 = vadd.f32 %v2970_v38, %v3990_v18 }
 0x347   :  { %v1393_v2 = vpop.f32.mrf.mxu0 }
 0x348   :  { %v1394_v10 = vadd.f32 %v3990_v18, %v1393_v2  ;;  %v1450_v47 = vmax.f32 %v1402_v16, 0.0 }
 0x349   :  { %v2971_v9 = vpop.f32.mrf.mxu0 }
 0x34a   :  { %1722 = vmatmul.mubr.bf16.gmra.mxu1 %v1467_v8  ;;  %v1448_v39 = vmax.f32 %v1394_v10, 0.0  ;;  %v1405_v13 = vadd.f32 %v2971_v9, %v3990_v18 }
 0x34b   :  { %v1396_v30 = vpop.f32.mrf.mxu0  ;;  %1731 = vmatprep.mubr.bf16.mxu1 %v3648_v55 }
 0x34c   :  { %v1397_v11 = vadd.f32 %v3990_v18, %v1396_v30  ;;  %v1451_v17 = vmax.f32 %v1405_v13, 0.0 }
 0x34e   :  { %v1449_v49 = vmax.f32 %v1397_v11, 0.0  ;;  %v1469_v20 = vpack.c.bf16 %v1451_v17, %v1450_v47 }
 0x350   :  { %v1468_v40 = vpack.c.bf16 %v1449_v49, %v1448_v39 }
 0x352   :  { %1732 = vmatmul.mubr.bf16.gmra.mxu1 %v1468_v40 }
 0x353   :  { %1741 = vmatprep.mubr.bf16.mxu1 %v3648_v55 }
 0x355   :  { %v2974_v4 = vpop.f32.mrf.mxu0 }
 0x356   :  { %v1418_v29 = vadd.f32 %v2974_v4, %v3990_v18 }
 0x357   :  { %v1409_v19 = vpop.f32.mrf.mxu0 }
 0x358   :  { %v1410_v5 = vadd.f32 %v3990_v18, %v1409_v19  ;;  %v1454_v32 = vmax.f32 %v1418_v29, 0.0 }
 0x359   :  { %v2975_v21 = vpop.f32.mrf.mxu0 }
 0x35a   :  { %1742 = vmatmul.mubr.bf16.gmra.mxu1 %v1469_v20  ;;  %v1452_v23 = vmax.f32 %v1410_v5, 0.0  ;;  %v1421_v28 = vadd.f32 %v2975_v21, %v3990_v18 }
 0x35b   :  { %v1412_v48 = vpop.f32.mrf.mxu0  ;;  %1751 = vmatprep.mubr.bf16.mxu1 %v3648_v55 }
 0x35c   :  { %v1413_v22 = vadd.f32 %v3990_v18, %v1412_v48  ;;  %v1455_v31 = vmax.f32 %v1421_v28, 0.0 }
 0x35e   :  { %v1453_v24 = vmax.f32 %v1413_v22, 0.0  ;;  %v1471_v33 = vpack.c.bf16 %v1455_v31, %v1454_v32 }
 0x360   :  { %v1470_v60 = vpack.c.bf16 %v1453_v24, %v1452_v23 }
 0x362   :  { %1752 = vmatmul.mubr.bf16.gmra.mxu1 %v1470_v60 }
 0x363   :  { %1761 = vmatprep.mubr.bf16.mxu1 %v3648_v55 }
 0x36a   :  { %1762 = vmatmul.mubr.bf16.gmra.mxu1 %v1471_v33 }
 0x3b2   :  { %v1613_v18 = vpop.f32.mrf.mxu1 }
 0x3b3   :  { %v1614_v36 = vadd.f32 %v1613_v18, %v4044_v34 }
 0x3b4   :  { %v1615_v55 = vpop.f32.mrf.mxu1 }
 0x3b5   :  { %v2585_v61 = vmul.f32 -1.442695, %v1614_v36  ;;  %v1616_v37 = vadd.f32 %v1615_v55, %v4048_v50 }
 0x3b6   :  { %v1617_v41 = vpop.f32.mrf.mxu1 }
 0x3b7   :  { %3190 = vpow2.f32 %v2585_v61  ;;  %v2586_v6 = vmul.f32 -1.442695, %v1616_v37  ;;  %v1618_v62 = vadd.f32 %v1617_v41, %v4044_v34 }
 0x3b8   :  { %v1619_v14 = vpop.f32.mrf.mxu1 }
 0x3b9   :  { %3192 = vpow2.f32 %v2586_v6  ;;  %v2587_v1 = vmul.f32 -1.442695, %v1618_v62  ;;  %v1620_v42 = vadd.f32 %v1619_v14, %v4048_v50 }
 0x3ba   :  { %v1623_v0 = vpop.f32.mrf.mxu1 }
 0x3bb   :  { %3194 = vpow2.f32 %v2587_v1  ;;  %v2588_v3 = vmul.f32 -1.442695, %v1620_v42  ;;  %v1624_v43 = vadd.f32 %v1623_v0, %v4044_v34 }
 0x3bc   :  { %v1625_v44 = vpop.f32.mrf.mxu1 }
 0x3bd   :  { %3196 = vpow2.f32 %v2588_v3  ;;  %v2589_v45 = vmul.f32 -1.442695, %v1624_v43  ;;  %v1626_v46 = vadd.f32 %v1625_v44, %v4048_v50 }
 0x3be   :  { %v1627_v15 = vpop.f32.mrf.mxu1 }
 0x3bf   :  { %3198 = vpow2.f32 %v2589_v45  ;;  %v2590_v51 = vmul.f32 -1.442695, %v1626_v46  ;;  %v1628_v7 = vadd.f32 %v1627_v15, %v4044_v34 }
 0x3c0   :  { %v1629_v27 = vpop.f32.mrf.mxu1 }
 0x3c1   :  { %3200 = vpow2.f32 %v2590_v51  ;;  %v2591_v52 = vmul.f32 -1.442695, %v1628_v7  ;;  %v1630_v53 = vadd.f32 %v1629_v27, %v4048_v50 }
 0x3c2   :  { %v1633_v54 = vpop.f32.mrf.mxu1 }
 0x3c3   :  { %3202 = vpow2.f32 %v2591_v52  ;;  %v2592_v25 = vmul.f32 -1.442695, %v1630_v53  ;;  %v1634_v56 = vadd.f32 %v1633_v54, %v4044_v34 }
 0x3c4   :  { %v3191_v57 = vpop.eup %3190  ;;  %v1635_v58 = vpop.f32.mrf.mxu1 }
 0x3c5   :  { %v1964_v26 = vadd.f32 1.0, %v3191_v57  ;;  %3204 = vpow2.f32 %v2592_v25  ;;  %v2593_v59 = vmul.f32 -1.442695, %v1634_v56  ;;  %v1636_v63 = vadd.f32 %v1635_v58, %v4048_v50 }
 0x3c6   :  { %v3193_v38 = vpop.eup %3192  ;;  %v1637_v35 = vpop.f32.mrf.mxu1 }
 0x3c7   :  { %3206 = vrcp.f32 %v1964_v26  ;;  %v1965_v2 = vadd.f32 1.0, %v3193_v38  ;;  %v2594_v8 = vmul.f32 -1.442695, %v1636_v63  ;;  %v1638_v9 = vadd.f32 %v1637_v35, %v4044_v34 }
 0x3c8   :  { %v3195_v10 = vpop.eup %3194  ;;  %3208 = vpow2.f32 %v2593_v59  ;;  %v1639_v30 = vpop.f32.mrf.mxu1 }
 0x3c9   :  { %3210 = vrcp.f32 %v1965_v2  ;;  %v1966_v11 = vadd.f32 1.0, %v3195_v10  ;;  %v2595_v39 = vmul.f32 -1.442695, %v1638_v9  ;;  %v1640_v49 = vadd.f32 %v1639_v30, %v4048_v50 }
 0x3ca   :  { %v3197_v13 = vpop.eup %3196  ;;  %3212 = vpow2.f32 %v2594_v8  ;;  %v1643_v40 = vpop.f32.mrf.mxu1 }
 0x3cb   :  { %3214 = vrcp.f32 %v1966_v11  ;;  %v1967_v16 = vadd.f32 1.0, %v3197_v13  ;;  %v2596_v17 = vmul.f32 -1.442695, %v1640_v49  ;;  %v1644_v4 = vadd.f32 %v1643_v40, %v4044_v34 }
 0x3cc   :  { %v3199_v47 = vpop.eup %3198  ;;  %3216 = vpow2.f32 %v2595_v39  ;;  %v1645_v19 = vpop.f32.mrf.mxu1 }
 0x3cd   :  { %3218 = vrcp.f32 %v1967_v16  ;;  %v1968_v20 = vadd.f32 1.0, %v3199_v47  ;;  %v2597_v21 = vmul.f32 -1.442695, %v1644_v4  ;;  %v1646_v5 = vadd.f32 %v1645_v19, %v4048_v50 }
 0x3ce   :  { %v3201_v48 = vpop.eup %3200  ;;  %3220 = vpow2.f32 %v2596_v17  ;;  %v1647_v22 = vpop.f32.mrf.mxu1 }
 0x3cf   :  { %3222 = vrcp.f32 %v1968_v20  ;;  %v1969_v23 = vadd.f32 1.0, %v3201_v48  ;;  %v2598_v24 = vmul.f32 -1.442695, %v1646_v5  ;;  %v1648_v28 = vadd.f32 %v1647_v22, %v4044_v34 }
 0x3d0   :  { %v3203_v60 = vpop.eup %3202  ;;  %3224 = vpow2.f32 %v2597_v21  ;;  %v1649_v29 = vpop.f32.mrf.mxu1 }
 0x3d1   :  { %3226 = vrcp.f32 %v1969_v23  ;;  %v1970_v31 = vadd.f32 1.0, %v3203_v60  ;;  %v2599_v32 = vmul.f32 -1.442695, %v1648_v28  ;;  %v1650_v33 = vadd.f32 %v1649_v29, %v4048_v50 }
 0x3d2   :  { %v3205_v12 = vpop.eup %3204  ;;  %3228 = vpow2.f32 %v2598_v24  ;;  %v1653_v18 = vpop.f32.mrf.mxu1 }
 0x3d3   :  { %3230 = vrcp.f32 %v1970_v31  ;;  %v1971_v36 = vadd.f32 1.0, %v3205_v12  ;;  %v2600_v55 = vmul.f32 -1.442695, %v1650_v33  ;;  %v1654_v61 = vadd.f32 %v1653_v18, %v4044_v34 }
 0x3d4   :  { %v3207_v37 = vpop.eup %3206  ;;  %3232 = vpow2.f32 %v2599_v32  ;;  %v1655_v41 = vpop.f32.mrf.mxu1 }
 0x3d5   :  { %v3209_v6 = vpop.eup %3208  ;;  %3234 = vrcp.f32 %v1971_v36  ;;  %v2601_v62 = vmul.f32 -1.442695, %v1654_v61  ;;  %v1656_v14 = vadd.f32 %v1655_v41, %v4048_v50 }
 0x3d6   :  { %v3211_v1 = vpop.eup %3210  ;;  %v1972_v42 = vadd.f32 1.0, %v3209_v6  ;;  %3236 = vpow2.f32 %v2600_v55  ;;  %v1657_v0 = vpop.f32.mrf.mxu1 }
 0x3d7   :  { %3577 = shalt.err (!%p3574_p6)
}
 0x3d8   :  { %2467 = dma.vmem_to_hbm [thread:$0]  %s2462_s25, 4096, %s4140_s8, [#allocation15], %s3643_s21, %s3643_s21, %s3644_s22   ;;  %v3213_v3 = vpop.eup %3212  ;;  %v2681_v43 = vpack.c.bf16 %v3211_v1, %v3207_v37  ;;  %3238 = vpow2.f32 %v2601_v62  ;;  %v2602_v44 = vmul.f32 -1.442695, %v1656_v14  ;;  %v1658_v45 = vadd.f32 %v1657_v0, %v4044_v34  ;;  %v1659_v51 = vpop.f32.mrf.mxu1 }
 0x3d9   :  { %v3215_v46 = vpop.eup %3214  ;;  %3240 = vrcp.f32 %v1972_v42  ;;  %v1973_v15 = vadd.f32 1.0, %v3213_v3  ;;  %s3650_s29 = smov [#allocation16]   ;;  %v1660_v52 = vadd.f32 %v1659_v51, %v4048_v50 }
 0x3da   :  { %s2473_s3 = sshll.u32 %s3650_s29, 4  ;;  %v3217_v7 = vpop.eup %3216  ;;  %2348 = vst [vmem:[#allocation13] sm:$0xff] %v2681_v43  ;;  %3242 = vpow2.f32 %v2602_v44  ;;  %v2603_v27 = vmul.f32 -1.442695, %v1658_v45  ;;  %v1663_v25 = vpop.f32.mrf.mxu1  ;;  %s2474_s3 = int_to_ptr.vmem [resolvable:$true] %s2473_s3 }
 0x3db   :  { %v3219_v53 = vpop.eup %3218  ;;  %3244 = vrcp.f32 %v1973_v15  ;;  %v1974_v54 = vadd.f32 1.0, %v3217_v7  ;;  %s3586_s8 = scalar_lea.vmem %s2474_s3, 4096  ;;  %p3591_p8 = scmp.lt.s32.totalorder %s2474_s3, %s2474_s3 }
 0x3dc   :  { %p3587_p7 = scmp.ne.s32.totalorder %s2474_s3, %s3586_s8  ;;  %p3592_p9 = scmp.lt.s32.totalorder %s3586_s8, %s3586_s8 }
 0x3de   :  { %p3593_p10 = por %p3592_p9, %p3591_p8 }
 0x3e0   :  { %p3594_p11 = pnand %p3593_p10, %p3587_p7 }
 0x3e2   :  { %3597 = shalt.err (!%p3594_p11)
}
 0x3e3   :  { %2479 = dma.vmem_to_hbm [thread:$0]  %s2474_s3, 4096, %s4141_s9, [#allocation15], %s3643_s21, %s3643_s21, %s3644_s22   ;;  %v3221_v56 = vpop.eup %3220  ;;  %v2682_v57 = vpack.c.bf16 %v3219_v53, %v3215_v46  ;;  %3246 = vpow2.f32 %v2603_v27  ;;  %v2604_v58 = vmul.f32 -1.442695, %v1660_v52  ;;  %v1664_v26 = vadd.f32 %v1663_v25, %v4044_v34  ;;  %v1665_v38 = vpop.f32.mrf.mxu1 }
 0x3e4   :  { %v3223_v59 = vpop.eup %3222  ;;  %3248 = vrcp.f32 %v1974_v54  ;;  %v1975_v63 = vadd.f32 1.0, %v3221_v56  ;;  %v1666_v8 = vadd.f32 %v1665_v38, %v4048_v50  ;;  %s3651_s9 = smov [#allocation13]  }
 0x3e5   :  { %v3225_v35 = vpop.eup %3224  ;;  %2349 = vst [vmem:[#allocation13 + $0x8] sm:$0xff] %v2682_v57  ;;  %3250 = vpow2.f32 %v2604_v58  ;;  %v2605_v2 = vmul.f32 -1.442695, %v1664_v26  ;;  %v1667_v30 = vpop.f32.mrf.mxu1  ;;  %s2449_s11 = sshll.u32 %s3651_s9, 4  ;;  %s2450_s11 = int_to_ptr.vmem [resolvable:$true] %s2449_s11 }
 0x3e6   :  { %v3227_v9 = vpop.eup %3226  ;;  %3252 = vrcp.f32 %v1975_v63  ;;  %v1976_v10 = vadd.f32 1.0, %v3225_v35  ;;  %v2606_v49 = vmul.f32 -1.442695, %v1666_v8  ;;  %v1668_v13 = vadd.f32 %v1667_v30, %v4044_v34  ;;  %s3606_s0 = scalar_lea.vmem %s2450_s11, 4096  ;;  %p3611_p13 = scmp.lt.s32.totalorder %s2450_s11, %s2450_s11 }
 0x3e7   :  { %v3229_v11 = vpop.eup %3228  ;;  %v2683_v39 = vpack.c.bf16 %v3227_v9, %v3223_v59  ;;  %3254 = vpow2.f32 %v2605_v2  ;;  %v1669_v17 = vpop.f32.mrf.mxu1  ;;  %p3607_p12 = scmp.ne.s32.totalorder %s2450_s11, %s3606_s0  ;;  %p3612_p0 = scmp.lt.s32.totalorder %s3606_s0, %s3606_s0 }
 0x3e8   :  { %v3231_v40 = vpop.eup %3230  ;;  %3256 = vrcp.f32 %v1976_v10  ;;  %v1977_v16 = vadd.f32 1.0, %v3229_v11  ;;  %v2607_v47 = vmul.f32 -1.442695, %v1668_v13  ;;  %v1670_v19 = vadd.f32 %v1669_v17, %v4048_v50 }
 0x3e9   :  { %v3233_v4 = vpop.eup %3232  ;;  %2350 = vst [vmem:[#allocation13 + $0x10] sm:$0xff] %v2683_v39  ;;  %3258 = vpow2.f32 %v2606_v49  ;;  %v1673_v5 = vpop.f32.mrf.mxu1  ;;  %p3613_p1 = por %p3612_p0, %p3611_p13 }
 0x3ea   :  { %v3235_v20 = vpop.eup %3234  ;;  %3260 = vrcp.f32 %v1977_v16  ;;  %v1978_v21 = vadd.f32 1.0, %v3233_v4  ;;  %v2608_v23 = vmul.f32 -1.442695, %v1670_v19  ;;  %v1674_v24 = vadd.f32 %v1673_v5, %v4044_v34 }
 0x3eb   :  { %v3237_v48 = vpop.eup %3236  ;;  %v2684_v22 = vpack.c.bf16 %v3235_v20, %v3231_v40  ;;  %3262 = vpow2.f32 %v2607_v47  ;;  %v1675_v29 = vpop.f32.mrf.mxu1  ;;  %p3614_p2 = pnand %p3613_p1, %p3607_p12 }
 0x3ec   :  { %v3239_v28 = vpop.eup %3238  ;;  %3264 = vrcp.f32 %v1978_v21  ;;  %v1979_v60 = vadd.f32 1.0, %v3237_v48  ;;  %v2609_v33 = vmul.f32 -1.442695, %v1674_v24  ;;  %v1676_v12 = vadd.f32 %v1675_v29, %v4048_v50 }
 0x3ed   :  { %v3241_v31 = vpop.eup %3240  ;;  %2351 = vst [vmem:[#allocation13 + $0x18] sm:$0xff] %v2684_v22  ;;  %v1980_v32 = vadd.f32 1.0, %v3239_v28  ;;  %3266 = vpow2.f32 %v2608_v23  ;;  %v1677_v36 = vpop.f32.mrf.mxu1 }
 0x3ee   :  { %v3243_v18 = vpop.eup %3242  ;;  %3268 = vrcp.f32 %v1979_v60  ;;  %v2610_v37 = vmul.f32 -1.442695, %v1676_v12  ;;  %v1678_v41 = vadd.f32 %v1677_v36, %v4044_v34 }
 0x3ef   :  { %v3245_v55 = vpop.eup %3244  ;;  %3270 = vrcp.f32 %v1980_v32  ;;  %v1981_v61 = vadd.f32 1.0, %v3243_v18  ;;  %v1679_v14 = vpop.f32.mrf.mxu1 }
 0x3f0   :  { %v3247_v6 = vpop.eup %3246  ;;  %v2685_v62 = vpack.c.bf16 %v3245_v55, %v3241_v31  ;;  %3272 = vpow2.f32 %v2609_v33  ;;  %v2611_v0 = vmul.f32 -1.442695, %v1678_v41  ;;  %v1680_v3 = vadd.f32 %v1679_v14, %v4048_v50 }
 0x3f1   :  { %v3249_v1 = vpop.eup %3248  ;;  %3274 = vrcp.f32 %v1981_v61  ;;  %v1982_v42 = vadd.f32 1.0, %v3247_v6  ;;  %v1683_v44 = vpop.f32.mrf.mxu1 }
 0x3f2   :  { %v3251_v43 = vpop.eup %3250  ;;  %2352 = vst [vmem:[#allocation13 + $0x20] sm:$0xff] %v2685_v62  ;;  %3276 = vpow2.f32 %v2610_v37  ;;  %v2612_v15 = vmul.f32 -1.442695, %v1680_v3  ;;  %v1684_v51 = vadd.f32 %v1683_v44, %v4044_v34 }
 0x3f3   :  { %v3253_v45 = vpop.eup %3252  ;;  %3278 = vrcp.f32 %v1982_v42  ;;  %v1983_v46 = vadd.f32 1.0, %v3251_v43  ;;  %v1685_v52 = vpop.f32.mrf.mxu1 }
 0x3f4   :  { %v3255_v7 = vpop.eup %3254  ;;  %v2686_v27 = vpack.c.bf16 %v3253_v45, %v3249_v1  ;;  %3280 = vpow2.f32 %v2611_v0  ;;  %v2613_v25 = vmul.f32 -1.442695, %v1684_v51  ;;  %v1686_v56 = vadd.f32 %v1685_v52, %v4048_v50 }
 0x3f5   :  { %v3257_v53 = vpop.eup %3256  ;;  %3282 = vrcp.f32 %v1983_v46  ;;  %v1984_v54 = vadd.f32 1.0, %v3255_v7  ;;  %v1687_v58 = vpop.f32.mrf.mxu1 }
 0x3f6   :  { %v3259_v57 = vpop.eup %3258  ;;  %2353 = vst [vmem:[#allocation13 + $0x28] sm:$0xff] %v2686_v27  ;;  %3284 = vpow2.f32 %v2612_v15  ;;  %v2614_v63 = vmul.f32 -1.442695, %v1686_v56  ;;  %v1688_v38 = vadd.f32 %v1687_v58, %v4044_v34 }
 0x3f7   :  { %v3261_v26 = vpop.eup %3260  ;;  %3286 = vrcp.f32 %v1984_v54  ;;  %v1985_v59 = vadd.f32 1.0, %v3259_v57  ;;  %v1689_v8 = vpop.f32.mrf.mxu1 }
 0x3f8   :  { %v3263_v35 = vpop.eup %3262  ;;  %v2687_v2 = vpack.c.bf16 %v3261_v26, %v3257_v53  ;;  %3288 = vpow2.f32 %v2613_v25  ;;  %v2615_v30 = vmul.f32 -1.442695, %v1688_v38  ;;  %v1690_v11 = vadd.f32 %v1689_v8, %v4048_v50 }
 0x3f9   :  { %v3265_v9 = vpop.eup %3264  ;;  %3290 = vrcp.f32 %v1985_v59  ;;  %v1986_v10 = vadd.f32 1.0, %v3263_v35  ;;  %v1693_v49 = vpop.f32.mrf.mxu1 }
 0x3fa   :  { %v3267_v39 = vpop.eup %3266  ;;  %2354 = vst [vmem:[#allocation13 + $0x30] sm:$0xff] %v2687_v2  ;;  %3292 = vpow2.f32 %v2614_v63  ;;  %v2616_v16 = vmul.f32 -1.442695, %v1690_v11  ;;  %v1694_v17 = vadd.f32 %v1693_v49, %v4044_v34 }
 0x3fb   :  { %v3269_v13 = vpop.eup %3268  ;;  %3294 = vrcp.f32 %v1986_v10  ;;  %v1987_v40 = vadd.f32 1.0, %v3267_v39  ;;  %v1695_v19 = vpop.f32.mrf.mxu1 }
 0x3fc   :  { %v3271_v4 = vpop.eup %3270  ;;  %v2688_v47 = vpack.c.bf16 %v3269_v13, %v3265_v9  ;;  %3296 = vpow2.f32 %v2615_v30  ;;  %v2617_v21 = vmul.f32 -1.442695, %v1694_v17  ;;  %v1696_v5 = vadd.f32 %v1695_v19, %v4048_v50 }
 0x3fd   :  { %v3273_v20 = vpop.eup %3272  ;;  %3298 = vrcp.f32 %v1987_v40  ;;  %v1697_v23 = vpop.f32.mrf.mxu1 }
 0x3fe   :  { %v3275_v48 = vpop.eup %3274  ;;  %2355 = vst [vmem:[#allocation13 + $0x38] sm:$0xff] %v2688_v47  ;;  %v1988_v22 = vadd.f32 1.0, %v3273_v20  ;;  %3300 = vpow2.f32 %v2616_v16  ;;  %v2618_v60 = vmul.f32 -1.442695, %v1696_v5  ;;  %v1698_v29 = vadd.f32 %v1697_v23, %v4044_v34 }
 0x3ff   :  { %v3277_v24 = vpop.eup %3276  ;;  %v2689_v28 = vpack.c.bf16 %v3275_v48, %v3271_v4  ;;  %3302 = vpow2.f32 %v2617_v21  ;;  %v1699_v33 = vpop.f32.mrf.mxu1 }
 0x400   :  { %v3279_v31 = vpop.eup %3278  ;;  %3304 = vrcp.f32 %v1988_v22  ;;  %v1989_v32 = vadd.f32 1.0, %v3277_v24  ;;  %v2619_v18 = vmul.f32 -1.442695, %v1698_v29  ;;  %v1700_v36 = vadd.f32 %v1699_v33, %v4048_v50 }
 0x401   :  { %v3281_v12 = vpop.eup %3280  ;;  %2356 = vst [vmem:[#allocation13 + $0x40] sm:$0xff] %v2689_v28  ;;  %3306 = vpow2.f32 %v2618_v60  ;;  %v1703_v37 = vpop.f32.mrf.mxu1 }
 0x402   :  { %v3283_v55 = vpop.eup %3282  ;;  %3308 = vrcp.f32 %v1989_v32  ;;  %v1990_v61 = vadd.f32 1.0, %v3281_v12  ;;  %v2620_v62 = vmul.f32 -1.442695, %v1700_v36  ;;  %v1704_v14 = vadd.f32 %v1703_v37, %v4044_v34 }
 0x403   :  { %v3285_v41 = vpop.eup %3284  ;;  %v2690_v6 = vpack.c.bf16 %v3283_v55, %v3279_v31  ;;  %3310 = vpow2.f32 %v2619_v18  ;;  %v1705_v0 = vpop.f32.mrf.mxu1 }
 0x404   :  { %v3287_v1 = vpop.eup %3286  ;;  %3312 = vrcp.f32 %v1990_v61  ;;  %v1991_v42 = vadd.f32 1.0, %v3285_v41  ;;  %v2621_v43 = vmul.f32 -1.442695, %v1704_v14  ;;  %v1706_v44 = vadd.f32 %v1705_v0, %v4048_v50 }
 0x405   :  { %v3289_v3 = vpop.eup %3288  ;;  %2357 = vst [vmem:[#allocation13 + $0x48] sm:$0xff] %v2690_v6  ;;  %3314 = vpow2.f32 %v2620_v62  ;;  %v1707_v15 = vpop.f32.mrf.mxu1 }
 0x406   :  { %v3291_v45 = vpop.eup %3290  ;;  %3316 = vrcp.f32 %v1991_v42  ;;  %v1992_v46 = vadd.f32 1.0, %v3289_v3  ;;  %v2622_v27 = vmul.f32 -1.442695, %v1706_v44  ;;  %v1708_v52 = vadd.f32 %v1707_v15, %v4044_v34 }
 0x407   :  { %v3293_v51 = vpop.eup %3292  ;;  %v2691_v7 = vpack.c.bf16 %v3291_v45, %v3287_v1  ;;  %3318 = vpow2.f32 %v2621_v43  ;;  %v1709_v25 = vpop.f32.mrf.mxu1 }
 0x408   :  { %v3295_v53 = vpop.eup %3294  ;;  %3320 = vrcp.f32 %v1992_v46  ;;  %v1993_v54 = vadd.f32 1.0, %v3293_v51  ;;  %v2623_v57 = vmul.f32 -1.442695, %v1708_v52  ;;  %v1710_v58 = vadd.f32 %v1709_v25, %v4048_v50 }
 0x409   :  { %v3297_v56 = vpop.eup %3296  ;;  %2358 = vst [vmem:[#allocation13 + $0x50] sm:$0xff] %v2691_v7  ;;  %3322 = vpow2.f32 %v2622_v27  ;;  %v1713_v63 = vpop.f32.mrf.mxu1 }
 0x40a   :  { %v3299_v26 = vpop.eup %3298  ;;  %3324 = vrcp.f32 %v1993_v54  ;;  %v1994_v59 = vadd.f32 1.0, %v3297_v56  ;;  %v2624_v2 = vmul.f32 -1.442695, %v1710_v58  ;;  %v1714_v8 = vadd.f32 %v1713_v63, %v4044_v34 }
 0x40b   :  { %v3301_v38 = vpop.eup %3300  ;;  %v2692_v35 = vpack.c.bf16 %v3299_v26, %v3295_v53  ;;  %3326 = vpow2.f32 %v2623_v57  ;;  %v1715_v30 = vpop.f32.mrf.mxu1 }
 0x40c   :  { %v3303_v9 = vpop.eup %3302  ;;  %3328 = vrcp.f32 %v1994_v59  ;;  %v1995_v10 = vadd.f32 1.0, %v3301_v38  ;;  %v2625_v49 = vmul.f32 -1.442695, %v1714_v8  ;;  %v1716_v13 = vadd.f32 %v1715_v30, %v4048_v50 }
 0x40d   :  { %v3305_v11 = vpop.eup %3304  ;;  %2359 = vst [vmem:[#allocation13 + $0x58] sm:$0xff] %v2692_v35  ;;  %v1996_v39 = vadd.f32 1.0, %v3303_v9  ;;  %3330 = vpow2.f32 %v2624_v2  ;;  %v1717_v16 = vpop.f32.mrf.mxu1 }
 0x40e   :  { %v3307_v40 = vpop.eup %3306  ;;  %3332 = vrcp.f32 %v1995_v10  ;;  %v2626_v47 = vmul.f32 -1.442695, %v1716_v13  ;;  %v1718_v19 = vadd.f32 %v1717_v16, %v4044_v34 }
 0x40f   :  { %v3309_v17 = vpop.eup %3308  ;;  %3334 = vrcp.f32 %v1996_v39  ;;  %v1997_v4 = vadd.f32 1.0, %v3307_v40  ;;  %v1719_v5 = vpop.f32.mrf.mxu1 }
 0x410   :  { %v3311_v20 = vpop.eup %3310  ;;  %v2693_v21 = vpack.c.bf16 %v3309_v17, %v3305_v11  ;;  %3336 = vpow2.f32 %v2625_v49  ;;  %v2627_v23 = vmul.f32 -1.442695, %v1718_v19  ;;  %v1720_v24 = vadd.f32 %v1719_v5, %v4048_v50 }
 0x411   :  { %v3313_v48 = vpop.eup %3312  ;;  %3338 = vrcp.f32 %v1997_v4  ;;  %v1998_v22 = vadd.f32 1.0, %v3311_v20  ;;  %v1723_v60 = vpop.f32.mrf.mxu1 }
 0x412   :  { %v3315_v28 = vpop.eup %3314  ;;  %2360 = vst [vmem:[#allocation13 + $0x60] sm:$0xff] %v2693_v21  ;;  %3340 = vpow2.f32 %v2626_v47  ;;  %v2628_v32 = vmul.f32 -1.442695, %v1720_v24  ;;  %v1724_v33 = vadd.f32 %v1723_v60, %v4044_v34 }
 0x413   :  { %v3317_v29 = vpop.eup %3316  ;;  %3342 = vrcp.f32 %v1998_v22  ;;  %v1999_v31 = vadd.f32 1.0, %v3315_v28  ;;  %v1725_v36 = vpop.f32.mrf.mxu1 }
 0x414   :  { %v3319_v12 = vpop.eup %3318  ;;  %v2694_v18 = vpack.c.bf16 %v3317_v29, %v3313_v48  ;;  %3344 = vpow2.f32 %v2627_v23  ;;  %v2629_v37 = vmul.f32 -1.442695, %v1724_v33  ;;  %v1726_v41 = vadd.f32 %v1725_v36, %v4048_v50 }
 0x415   :  { %v3321_v55 = vpop.eup %3320  ;;  %3346 = vrcp.f32 %v1999_v31  ;;  %v2000_v61 = vadd.f32 1.0, %v3319_v12  ;;  %v1727_v62 = vpop.f32.mrf.mxu1 }
 0x416   :  { %v3323_v6 = vpop.eup %3322  ;;  %2361 = vst [vmem:[#allocation13 + $0x68] sm:$0xff] %v2694_v18  ;;  %3348 = vpow2.f32 %v2628_v32  ;;  %v2630_v42 = vmul.f32 -1.442695, %v1726_v41  ;;  %v1728_v0 = vadd.f32 %v1727_v62, %v4044_v34 }
 0x417   :  { %v3325_v14 = vpop.eup %3324  ;;  %3350 = vrcp.f32 %v2000_v61  ;;  %v2001_v1 = vadd.f32 1.0, %v3323_v6  ;;  %v1729_v44 = vpop.f32.mrf.mxu1 }
 0x418   :  { %v3327_v3 = vpop.eup %3326  ;;  %v2695_v43 = vpack.c.bf16 %v3325_v14, %v3321_v55  ;;  %3352 = vpow2.f32 %v2629_v37  ;;  %v2631_v15 = vmul.f32 -1.442695, %v1728_v0  ;;  %v1730_v51 = vadd.f32 %v1729_v44, %v4048_v50 }
 0x419   :  { %v3329_v45 = vpop.eup %3328  ;;  %3354 = vrcp.f32 %v2001_v1  ;;  %v2002_v46 = vadd.f32 1.0, %v3327_v3  ;;  %v1733_v27 = vpop.f32.mrf.mxu1 }
 0x41a   :  { %v3331_v7 = vpop.eup %3330  ;;  %2362 = vst [vmem:[#allocation13 + $0x70] sm:$0xff] %v2695_v43  ;;  %3356 = vpow2.f32 %v2630_v42  ;;  %v2632_v54 = vmul.f32 -1.442695, %v1730_v51  ;;  %v1734_v25 = vadd.f32 %v1733_v27, %v4044_v34 }
 0x41b   :  { %v3333_v52 = vpop.eup %3332  ;;  %3358 = vrcp.f32 %v2002_v46  ;;  %v2003_v53 = vadd.f32 1.0, %v3331_v7  ;;  %v1735_v58 = vpop.f32.mrf.mxu1 }
 0x41c   :  { %v3335_v56 = vpop.eup %3334  ;;  %v2696_v57 = vpack.c.bf16 %v3333_v52, %v3329_v45  ;;  %3360 = vpow2.f32 %v2631_v15  ;;  %v2633_v59 = vmul.f32 -1.442695, %v1734_v25  ;;  %v1736_v63 = vadd.f32 %v1735_v58, %v4048_v50 }
 0x41d   :  { %v3337_v26 = vpop.eup %3336  ;;  %3362 = vrcp.f32 %v2003_v53  ;;  %v1737_v2 = vpop.f32.mrf.mxu1 }
 0x41e   :  { %v3339_v38 = vpop.eup %3338  ;;  %2363 = vst [vmem:[#allocation13 + $0x78] sm:$0xff] %v2696_v57  ;;  %v2004_v35 = vadd.f32 1.0, %v3337_v26  ;;  %3364 = vpow2.f32 %v2632_v54  ;;  %v2634_v10 = vmul.f32 -1.442695, %v1736_v63  ;;  %v1738_v30 = vadd.f32 %v1737_v2, %v4044_v34 }
 0x41f   :  { %v3341_v8 = vpop.eup %3340  ;;  %v2697_v9 = vpack.c.bf16 %v3339_v38, %v3335_v56  ;;  %3366 = vpow2.f32 %v2633_v59  ;;  %v1739_v49 = vpop.f32.mrf.mxu1 }
 0x420   :  { %v3343_v11 = vpop.eup %3342  ;;  %3368 = vrcp.f32 %v2004_v35  ;;  %v2005_v39 = vadd.f32 1.0, %v3341_v8  ;;  %v2635_v40 = vmul.f32 -1.442695, %v1738_v30  ;;  %v1740_v16 = vadd.f32 %v1739_v49, %v4048_v50 }
 0x421   :  { %v3345_v13 = vpop.eup %3344  ;;  %2364 = vst [vmem:[#allocation13 + $0x80] sm:$0xff] %v2697_v9  ;;  %3370 = vpow2.f32 %v2634_v10  ;;  %v1743_v47 = vpop.f32.mrf.mxu1 }
 0x422   :  { %v3347_v17 = vpop.eup %3346  ;;  %3372 = vrcp.f32 %v2005_v39  ;;  %v2006_v4 = vadd.f32 1.0, %v3345_v13  ;;  %v2636_v21 = vmul.f32 -1.442695, %v1740_v16  ;;  %v1744_v5 = vadd.f32 %v1743_v47, %v4044_v34 }
 0x423   :  { %v3349_v19 = vpop.eup %3348  ;;  %v2698_v20 = vpack.c.bf16 %v3347_v17, %v3343_v11  ;;  %3374 = vpow2.f32 %v2635_v40  ;;  %v1745_v23 = vpop.f32.mrf.mxu1 }
 0x424   :  { %v3351_v48 = vpop.eup %3350  ;;  %3376 = vrcp.f32 %v2006_v4  ;;  %v2007_v22 = vadd.f32 1.0, %v3349_v19  ;;  %v2637_v28 = vmul.f32 -1.442695, %v1744_v5  ;;  %v1746_v60 = vadd.f32 %v1745_v23, %v4048_v50 }
 0x425   :  { %v3353_v24 = vpop.eup %3352  ;;  %2365 = vst [vmem:[#allocation13 + $0x88] sm:$0xff] %v2698_v20  ;;  %3378 = vpow2.f32 %v2636_v21  ;;  %v1747_v32 = vpop.f32.mrf.mxu1 }
 0x426   :  { %v3355_v29 = vpop.eup %3354  ;;  %3380 = vrcp.f32 %v2007_v22  ;;  %v2008_v31 = vadd.f32 1.0, %v3353_v24  ;;  %v2638_v18 = vmul.f32 -1.442695, %v1746_v60  ;;  %v1748_v36 = vadd.f32 %v1747_v32, %v4044_v34 }
 0x427   :  { %v3357_v33 = vpop.eup %3356  ;;  %v2699_v12 = vpack.c.bf16 %v3355_v29, %v3351_v48  ;;  %3382 = vpow2.f32 %v2637_v28  ;;  %v1749_v37 = vpop.f32.mrf.mxu1 }
 0x428   :  { %v3359_v55 = vpop.eup %3358  ;;  %3384 = vrcp.f32 %v2008_v31  ;;  %v2009_v61 = vadd.f32 1.0, %v3357_v33  ;;  %v2639_v6 = vmul.f32 -1.442695, %v1748_v36  ;;  %v1750_v62 = vadd.f32 %v1749_v37, %v4048_v50 }
 0x429   :  { %v3361_v41 = vpop.eup %3360  ;;  %2366 = vst [vmem:[#allocation13 + $0x90] sm:$0xff] %v2699_v12  ;;  %3386 = vpow2.f32 %v2638_v18  ;;  %v1753_v42 = vpop.f32.mrf.mxu1 }
 0x42a   :  { %v3363_v14 = vpop.eup %3362  ;;  %3388 = vrcp.f32 %v2009_v61  ;;  %v2010_v1 = vadd.f32 1.0, %v3361_v41  ;;  %v2640_v43 = vmul.f32 -1.442695, %v1750_v62  ;;  %v1754_v44 = vadd.f32 %v1753_v42, %v4044_v34 }
 0x42b   :  { %v3365_v0 = vpop.eup %3364  ;;  %v2700_v3 = vpack.c.bf16 %v3363_v14, %v3359_v55  ;;  %3390 = vpow2.f32 %v2639_v6  ;;  %v1755_v15 = vpop.f32.mrf.mxu1 }
 0x42c   :  { %v3367_v45 = vpop.eup %3366  ;;  %3392 = vrcp.f32 %v2010_v1  ;;  %v2011_v46 = vadd.f32 1.0, %v3365_v0  ;;  %v2641_v27 = vmul.f32 -1.442695, %v1754_v44  ;;  %v1756_v52 = vadd.f32 %v1755_v15, %v4048_v50 }
 0x42d   :  { %v3369_v51 = vpop.eup %3368  ;;  %2367 = vst [vmem:[#allocation13 + $0x98] sm:$0xff] %v2700_v3  ;;  %v2012_v7 = vadd.f32 1.0, %v3367_v45  ;;  %3394 = vpow2.f32 %v2640_v43  ;;  %v1757_v54 = vpop.f32.mrf.mxu1 }
 0x42e   :  { %v3371_v53 = vpop.eup %3370  ;;  %3396 = vrcp.f32 %v2011_v46  ;;  %v2642_v57 = vmul.f32 -1.442695, %v1756_v52  ;;  %v1758_v58 = vadd.f32 %v1757_v54, %v4044_v34 }
 0x42f   :  { %v3373_v25 = vpop.eup %3372  ;;  %3398 = vrcp.f32 %v2012_v7  ;;  %v2013_v56 = vadd.f32 1.0, %v3371_v53  ;;  %v1759_v63 = vpop.f32.mrf.mxu1 }
 0x430   :  { %v3375_v26 = vpop.eup %3374  ;;  %v2701_v59 = vpack.c.bf16 %v3373_v25, %v3369_v51  ;;  %3400 = vpow2.f32 %v2641_v27  ;;  %v2643_v2 = vmul.f32 -1.442695, %v1758_v58  ;;  %v1760_v8 = vadd.f32 %v1759_v63, %v4048_v50 }
 0x431   :  { %v3377_v38 = vpop.eup %3376  ;;  %3402 = vrcp.f32 %v2013_v56  ;;  %v2014_v35 = vadd.f32 1.0, %v3375_v26  ;;  %v1763_v10 = vpop.f32.mrf.mxu1 }
 0x432   :  { %v3379_v9 = vpop.eup %3378  ;;  %2368 = vst [vmem:[#allocation13 + $0xa0] sm:$0xff] %v2701_v59  ;;  %3404 = vpow2.f32 %v2642_v57  ;;  %v2644_v39 = vmul.f32 -1.442695, %v1760_v8  ;;  %v1764_v49 = vadd.f32 %v1763_v10, %v4044_v34 }
 0x433   :  { %v3381_v30 = vpop.eup %3380  ;;  %3406 = vrcp.f32 %v2014_v35  ;;  %v2015_v11 = vadd.f32 1.0, %v3379_v9  ;;  %v1765_v16 = vpop.f32.mrf.mxu1 }
 0x434   :  { %v3383_v13 = vpop.eup %3382  ;;  %v2702_v40 = vpack.c.bf16 %v3381_v30, %v3377_v38  ;;  %3408 = vpow2.f32 %v2643_v2  ;;  %v2645_v47 = vmul.f32 -1.442695, %v1764_v49  ;;  %v1766_v19 = vadd.f32 %v1765_v16, %v4048_v50 }
 0x435   :  { %v3385_v17 = vpop.eup %3384  ;;  %3410 = vrcp.f32 %v2015_v11  ;;  %v2016_v4 = vadd.f32 1.0, %v3383_v13  ;;  %v1767_v21 = vpop.f32.mrf.mxu1 }
 0x436   :  { %v3387_v20 = vpop.eup %3386  ;;  %2369 = vst [vmem:[#allocation13 + $0xa8] sm:$0xff] %v2702_v40  ;;  %3412 = vpow2.f32 %v2644_v39  ;;  %v2646_v22 = vmul.f32 -1.442695, %v1766_v19  ;;  %v1768_v23 = vadd.f32 %v1767_v21, %v4044_v34 }
 0x437   :  { %v3389_v5 = vpop.eup %3388  ;;  %3414 = vrcp.f32 %v2016_v4  ;;  %v2017_v48 = vadd.f32 1.0, %v3387_v20  ;;  %v1769_v60 = vpop.f32.mrf.mxu1 }
 0x438   :  { %v3391_v24 = vpop.eup %3390  ;;  %v2703_v28 = vpack.c.bf16 %v3389_v5, %v3385_v17  ;;  %3416 = vpow2.f32 %v2645_v47  ;;  %v2647_v32 = vmul.f32 -1.442695, %v1768_v23  ;;  %v1770_v33 = vadd.f32 %v1769_v60, %v4048_v50 }
 0x439   :  { %v3393_v29 = vpop.eup %3392  ;;  %3418 = vrcp.f32 %v2017_v48  ;;  %v2018_v31 = vadd.f32 1.0, %v3391_v24 }
 0x43a   :  { %v3395_v12 = vpop.eup %3394  ;;  %2370 = vst [vmem:[#allocation13 + $0xb0] sm:$0xff] %v2703_v28  ;;  %3420 = vpow2.f32 %v2646_v22  ;;  %v2648_v55 = vmul.f32 -1.442695, %v1770_v33 }
 0x43b   :  { %v3397_v18 = vpop.eup %3396  ;;  %3422 = vrcp.f32 %v2018_v31  ;;  %v2019_v36 = vadd.f32 1.0, %v3395_v12 }
 0x43c   :  { %v3399_v61 = vpop.eup %3398  ;;  %v2704_v37 = vpack.c.bf16 %v3397_v18, %v3393_v29  ;;  %3424 = vpow2.f32 %v2647_v32 }
 0x43d   :  { %v3401_v34 = vpop.eup %3400  ;;  %3426 = vrcp.f32 %v2019_v36 }
 0x43e   :  { %v3403_v41 = vpop.eup %3402  ;;  %2371 = vst [vmem:[#allocation13 + $0xb8] sm:$0xff] %v2704_v37  ;;  %v2020_v6 = vadd.f32 1.0, %v3401_v34  ;;  %3428 = vpow2.f32 %v2648_v55 }
 0x43f   :  { %v3405_v62 = vpop.eup %3404  ;;  %v2705_v14 = vpack.c.bf16 %v3403_v41, %v3399_v61 }
 0x440   :  { %v3407_v1 = vpop.eup %3406  ;;  %v2021_v50 = vadd.f32 1.0, %v3405_v62  ;;  %3430 = vrcp.f32 %v2020_v6 }
 0x441   :  { %v3409_v42 = vpop.eup %3408  ;;  %2372 = vst [vmem:[#allocation13 + $0xc0] sm:$0xff] %v2705_v14 }
 0x442   :  { %v3411_v0 = vpop.eup %3410  ;;  %3432 = vrcp.f32 %v2021_v50  ;;  %v2022_v3 = vadd.f32 1.0, %v3409_v42 }
 0x443   :  { %v3413_v43 = vpop.eup %3412  ;;  %v2706_v44 = vpack.c.bf16 %v3411_v0, %v3407_v1 }
 0x444   :  { %v3415_v45 = vpop.eup %3414  ;;  %v2023_v46 = vadd.f32 1.0, %v3413_v43  ;;  %3434 = vrcp.f32 %v2022_v3 }
 0x445   :  { %v3417_v15 = vpop.eup %3416  ;;  %2373 = vst [vmem:[#allocation13 + $0xc8] sm:$0xff] %v2706_v44 }
 0x446   :  { %v3419_v51 = vpop.eup %3418  ;;  %3436 = vrcp.f32 %v2023_v46  ;;  %v2024_v7 = vadd.f32 1.0, %v3417_v15 }
 0x447   :  { %v3421_v27 = vpop.eup %3420  ;;  %v2707_v52 = vpack.c.bf16 %v3419_v51, %v3415_v45 }
 0x448   :  { %v3423_v53 = vpop.eup %3422  ;;  %v2025_v54 = vadd.f32 1.0, %v3421_v27  ;;  %3438 = vrcp.f32 %v2024_v7 }
 0x449   :  { %v3425_v25 = vpop.eup %3424  ;;  %2374 = vst [vmem:[#allocation13 + $0xd0] sm:$0xff] %v2707_v52 }
 0x44a   :  { %v3427_v56 = vpop.eup %3426  ;;  %3440 = vrcp.f32 %v2025_v54  ;;  %v2026_v57 = vadd.f32 1.0, %v3425_v25 }
 0x44b   :  { %v3429_v58 = vpop.eup %3428  ;;  %v2708_v26 = vpack.c.bf16 %v3427_v56, %v3423_v53 }
 0x44c   :  { %v2027_v59 = vadd.f32 1.0, %v3429_v58  ;;  %3442 = vrcp.f32 %v2026_v57 }
 0x44d   :  { %2375 = vst [vmem:[#allocation13 + $0xd8] sm:$0xff] %v2708_v26  ;;  %v3431_v63 = vpop.eup %3430 }
 0x44e   :  { %3444 = vrcp.f32 %v2027_v59 }
 0x44f   :  { %v3433_v38 = vpop.eup %3432 }
 0x450   :  { %v2709_v35 = vpack.c.bf16 %v3433_v38, %v3431_v63 }
 0x451   :  { %v3435_v2 = vpop.eup %3434 }
 0x452   :  { %2376 = vst [vmem:[#allocation13 + $0xe0] sm:$0xff] %v2709_v35 }
 0x453   :  { %v3437_v8 = vpop.eup %3436 }
 0x454   :  { %v2710_v9 = vpack.c.bf16 %v3437_v8, %v3435_v2 }
 0x455   :  { %v3439_v10 = vpop.eup %3438 }
 0x456   :  { %2377 = vst [vmem:[#allocation13 + $0xe8] sm:$0xff] %v2710_v9 }
 0x457   :  { %v3441_v30 = vpop.eup %3440 }
 0x458   :  { %v2711_v11 = vpack.c.bf16 %v3441_v30, %v3439_v10 }
 0x459   :  { %v3443_v39 = vpop.eup %3442 }
 0x45a   :  { %2378 = vst [vmem:[#allocation13 + $0xf0] sm:$0xff] %v2711_v11 }
 0x45b   :  { %v3445_v49 = vpop.eup %3444 }
 0x45c   :  { %v2712_v13 = vpack.c.bf16 %v3445_v49, %v3443_v39 }
 0x45e   :  { %2379 = vst [vmem:[#allocation13 + $0xf8] sm:$0xff] %v2712_v13 }
 0x45f   :  { %3617 = shalt.err (!%p3614_p2)
}
 0x460   :  { %2455 = dma.vmem_to_hbm [thread:$0]  %s2450_s11, 4096, %s4139_s7, [#allocation4], %s3643_s21, %s3643_s21, %s3644_s22  }
 0x461   :  { %3634 = dma.done.wait [#allocation4], 4096  }
 0x462   :  { %3635 = vsyncadd [#allocation4], 4294963200 }
 0x463   :  { %3636 = dma.done.wait [#allocation15], 8192  }
 0x464   :  { %3637 = vsyncadd [#allocation15], 4294959104 }
 0x465   :  { %2489 = vsyncpa [#allocation3], 1 }
 0x466   :  { %2490 = vsyncpa [#allocation6], 1 }
 0x467   :  { %2491 = vsyncpa [#allocation9], 1 }
 0x468   :  { %2492 = vsyncpa [#allocation12], 1 }
 0x469   :  { %2493 = vsyncpa [#allocation4], 1 }
 0x46a   :  { %2494 = vsyncpa [#allocation15], 1 }

</bundles_post_ra>
